<compile_context>
chip_gen: v7x
topology: tpu7x:2x2x1
jax: 0.10.0
libtpu: 0.0.40
codegen_flags: <defaults>
</compile_context>

<pallas_src>
import functools

import jax
import jax.numpy as jnp
from jax.experimental import pallas as pl
from jax.experimental.pallas import tpu as pltpu

LANE = 128          # TPU lane width; conv/fc output channels padded to this
DEF_TM = 512        # M-tile rows for conv matmul kernels (bf16 in, f32 acc)
VMEM_LIMIT = 32 * 1024 * 1024


def _round_up(x, m):
    return (x + m - 1) // m * m


# ----------------------------------------------------------------------------
# Pallas kernel: fused  out = relu?( x_tile @ w + b )
#   x tile : (TM, K)  bf16   (streamed over the M grid axis)
#   w      : (K, Np)  bf16   (resident: same block for every grid step)
#   b      : (1, Np)  f32
# ----------------------------------------------------------------------------
def _matmul_bias_kernel(x_ref, w_ref, b_ref, o_ref, *, apply_relu):
    acc = jnp.dot(x_ref[...], w_ref[...], preferred_element_type=jnp.float32)
    acc = acc + b_ref[...]
    if apply_relu:
        acc = jnp.maximum(acc, 0.0)
    o_ref[...] = acc.astype(o_ref.dtype)


def matmul_bias(x, w, b, *, apply_relu, out_dtype, tm=DEF_TM):
    """x: (M, K) bf16, w: (K, Np) bf16 (Np multiple of 128), b: (1, Np) f32."""
    M, K = x.shape
    Kw, Np = w.shape
    assert K == Kw and Np % LANE == 0

    if M <= tm:
        block_m, grid_m = M, 1            # full-dim block: no divisibility constraint
    else:
        block_m, grid_m = tm, pl.cdiv(M, tm)

    return pl.pallas_call(
        functools.partial(_matmul_bias_kernel, apply_relu=apply_relu),
        out_shape=jax.ShapeDtypeStruct((M, Np), out_dtype),
        grid_spec=pl.GridSpec(
            grid=(grid_m,),
            in_specs=[
                pl.BlockSpec((block_m, K), lambda i: (i, 0)),   # streamed M tiles
                pl.BlockSpec((K, Np), lambda i: (0, 0)),        # resident weight
                pl.BlockSpec((1, Np), lambda i: (0, 0)),        # resident bias
            ],
            out_specs=pl.BlockSpec((block_m, Np), lambda i: (i, 0)),
        ),
        compiler_params=pltpu.CompilerParams(
            dimension_semantics=("parallel",),
            vmem_limit_bytes=VMEM_LIMIT),
    )(x, w, b)


# ----------------------------------------------------------------------------
# Pallas kernel: fused FC head   out = relu(x @ w1 + b1) @ w2 + b2
# ----------------------------------------------------------------------------
def _fc_head_kernel(x_ref, w1_ref, b1_ref, w2_ref, b2_ref, o_ref):
    h = jnp.dot(x_ref[...], w1_ref[...], preferred_element_type=jnp.float32)
    h = jnp.maximum(h + b1_ref[...], 0.0).astype(w2_ref.dtype)
    o = jnp.dot(h, w2_ref[...], preferred_element_type=jnp.float32)
    o_ref[...] = (o + b2_ref[...]).astype(o_ref.dtype)


def fc_head(x, w1, b1, w2, b2):
    """x: (B, K1) bf16; w1: (K1, H) bf16; w2: (H, Np) bf16; b*: f32 rows."""
    B, K1 = x.shape
    _, H = w1.shape
    _, Np = w2.shape
    return pl.pallas_call(
        _fc_head_kernel,
        out_shape=jax.ShapeDtypeStruct((B, Np), jnp.float32),
        grid_spec=pl.GridSpec(
            grid=(1,),
            in_specs=[
                pl.BlockSpec((B, K1), lambda i: (0, 0)),
                pl.BlockSpec((K1, H), lambda i: (0, 0)),
                pl.BlockSpec((1, H), lambda i: (0, 0)),
                pl.BlockSpec((H, Np), lambda i: (0, 0)),
                pl.BlockSpec((1, Np), lambda i: (0, 0)),
            ],
            out_specs=pl.BlockSpec((B, Np), lambda i: (0, 0)),
        ),
        compiler_params=pltpu.CompilerParams(
            dimension_semantics=("arbitrary",),
            vmem_limit_bytes=VMEM_LIMIT),
    )(x, w1, b1, w2, b2)


# ----------------------------------------------------------------------------
# Conv2d (valid padding, square stride) via NHWC im2col + Pallas matmul
# ----------------------------------------------------------------------------
def _im2col_nhwc(x, kh, kw, stride):
    """x: (N, H, W, C). Returns (N*Ho*Wo, kh*kw*C); K ordered (kh, kw, C)."""
    N, H, W, C = x.shape
    Ho = (H - kh) // stride + 1
    Wo = (W - kw) // stride + 1
    cols = []
    for i in range(kh):
        for j in range(kw):
            cols.append(
                x[:, i:i + stride * (Ho - 1) + 1:stride,
                     j:j + stride * (Wo - 1) + 1:stride, :])     # (N, Ho, Wo, C)
    patches = jnp.stack(cols, axis=3)                            # (N, Ho, Wo, kh*kw, C)
    return patches.reshape(N * Ho * Wo, kh * kw * C), Ho, Wo


def conv2d_nhwc(x, w_mat, b_row, kh, kw, stride):
    """x: (N, H, W, C) bf16 (C may be zero-padded); w_mat: (kh*kw*C, Op) bf16."""
    N = x.shape[0]
    patches, Ho, Wo = _im2col_nhwc(x, kh, kw, stride)
    out = matmul_bias(patches, w_mat, b_row, apply_relu=True,
                      out_dtype=jnp.bfloat16)
    return out.reshape(N, Ho, Wo, w_mat.shape[1])                # padded NHWC, bf16


# ----------------------------------------------------------------------------
# Parameter init (PyTorch layout/init) and one-time kernel-ready prep
# ----------------------------------------------------------------------------
def _uniform(key, shape, bound):
    return jax.random.uniform(key, shape, jnp.float32, -bound, bound)


def init_params(key, input_dims, output_dims, spatial):
    c_in = input_dims[0]
    ks = jax.random.split(key, 10)

    def conv_p(kw_, kb_, o, c, k):
        bound = 1.0 / jnp.sqrt(c * k * k)
        return _uniform(kw_, (o, c, k, k), bound), _uniform(kb_, (o,), bound)

    def lin_p(kw_, kb_, o, i):
        bound = 1.0 / jnp.sqrt(i)
        return _uniform(kw_, (o, i), bound), _uniform(kb_, (o,), bound)

    # replicate calculate_fc_input_dims
    h1 = (spatial - 8) // 4 + 1
    h2 = (h1 - 4) // 2 + 1
    h3 = (h2 - 3) // 1 + 1
    fc_in = 64 * h3 * h3

    p = {}
    p["conv1_w"], p["conv1_b"] = conv_p(ks[0], ks[1], 32, c_in, 8)
    p["conv2_w"], p["conv2_b"] = conv_p(ks[2], ks[3], 64, 32, 4)
    p["conv3_w"], p["conv3_b"] = conv_p(ks[4], ks[5], 64, 64, 3)
    p["fc1_w"], p["fc1_b"] = lin_p(ks[6], ks[7], 512, fc_in)
    p["fc2_w"], p["fc2_b"] = lin_p(ks[8], ks[9], output_dims, 512)
    return p


def _conv_wmat(w, b, c_pad):
    """(O, C, kh, kw) torch layout -> (kh*kw*c_pad, Op) bf16 + (1, Op) f32 bias."""
    O, C, kh, kw = w.shape
    Op = _round_up(O, LANE)
    wt = jnp.transpose(w, (2, 3, 1, 0))                          # (kh, kw, C, O)
    wt = jnp.pad(wt, ((0, 0), (0, 0), (0, c_pad - C), (0, Op - O)))
    wmat = wt.reshape(kh * kw * c_pad, Op).astype(jnp.bfloat16)
    brow = jnp.pad(b, (0, Op - O)).reshape(1, Op).astype(jnp.float32)
    return wmat, brow


def prepare_params(params, input_dims, spatial):
    """One-time conversion into padded, bf16, kernel-ready matrices."""
    c_in = input_dims[0]
    h1 = (spatial - 8) // 4 + 1
    h2 = (h1 - 4) // 2 + 1
    h3 = (h2 - 3) // 1 + 1

    p = {}
    p["conv1_w"], p["conv1_b"] = _conv_wmat(params["conv1_w"], params["conv1_b"], c_in)
    c1p = _round_up(params["conv1_w"].shape[0], LANE)            # padded ch of conv1 out
    p["conv2_w"], p["conv2_b"] = _conv_wmat(params["conv2_w"], params["conv2_b"], c1p)
    c2p = _round_up(params["conv2_w"].shape[0], LANE)
    p["conv3_w"], p["conv3_b"] = _conv_wmat(params["conv3_w"], params["conv3_b"], c2p)
    c3 = params["conv3_w"].shape[0]
    c3p = _round_up(c3, LANE)

    # fc1: torch (512, c3*h3*h3) flattened in (C, y, x) order -> (y, x, Cp, 512)
    fc1_out, fc_in = params["fc1_w"].shape
    assert fc_in == c3 * h3 * h3
    w1 = params["fc1_w"].reshape(fc1_out, c3, h3, h3)
    w1 = jnp.transpose(w1, (2, 3, 1, 0))                         # (y, x, C, 512)
    w1 = jnp.pad(w1, ((0, 0), (0, 0), (0, c3p - c3), (0, 0)))
    p["fc1_w"] = w1.reshape(h3 * h3 * c3p, fc1_out).astype(jnp.bfloat16)
    p["fc1_b"] = params["fc1_b"].reshape(1, fc1_out).astype(jnp.float32)

    out_dims = params["fc2_w"].shape[0]
    op2 = _round_up(out_dims, LANE)
    w2 = jnp.pad(params["fc2_w"].T, ((0, 0), (0, op2 - out_dims)))
    p["fc2_w"] = w2.astype(jnp.bfloat16)
    p["fc2_b"] = jnp.pad(params["fc2_b"], (0, op2 - out_dims)).reshape(1, op2)
    p["fc2_b"] = p["fc2_b"].astype(jnp.float32)
    return p


# ----------------------------------------------------------------------------
# Forward pass (mirrors ConvNeuralNet.forward)
# ----------------------------------------------------------------------------
@functools.partial(jax.jit, static_argnames=("n_actions",))
def forward(prepped, x_nchw, *, n_actions):
    # Single NCHW -> NHWC permute of the (small) raw input; everything after
    # stays in padded NHWC / lane-dense layout.
    x = jnp.transpose(x_nchw, (0, 2, 3, 1)).astype(jnp.bfloat16)
    c1 = conv2d_nhwc(x, prepped["conv1_w"], prepped["conv1_b"], 8, 8, 4)
    c2 = conv2d_nhwc(c1, prepped["conv2_w"], prepped["conv2_b"], 4, 4, 2)
    c3 = conv2d_nhwc(c2, prepped["conv3_w"], prepped["conv3_b"], 3, 3, 1)
    flat = c3.reshape(c3.shape[0], -1)         # fc1_w is pre-permuted to this order
    out = fc_head(flat, prepped["fc1_w"], prepped["fc1_b"],
                  prepped["fc2_w"], prepped["fc2_b"])
    return out[:, :n_actions]


# Pure-JAX f32 reference (PyTorch semantics) for checking the Pallas path.
def forward_ref(params, x):
    def conv_ref(y, w, b, s):
        o = jax.lax.conv_general_dilated(
            y, w, window_strides=(s, s), padding="VALID",
            dimension_numbers=("NCHW", "OIHW", "NCHW"))
        return jnp.maximum(o + b[None, :, None, None], 0.0)

    c1 = conv_ref(x, params["conv1_w"], params["conv1_b"], 4)
    c2 = conv_ref(c1, params["conv2_w"], params["conv2_b"], 2)
    c3 = conv_ref(c2, params["conv3_w"], params["conv3_b"], 1)
    flat = c3.reshape(c3.shape[0], -1)
    f1 = jnp.maximum(flat @ params["fc1_w"].T + params["fc1_b"], 0.0)
    return f1 @ params["fc2_w"].T + params["fc2_b"]


if __name__ == "__main__":
    # 40x40 input survives the conv stack: k8/s4 -> 9, k4/s2 -> 3, k3/s1 -> 1.
    batch, c_in, spatial, n_actions = 2, 4, 40, 6
    input_dims = (c_in, spatial, spatial)

    key = jax.random.PRNGKey(0)
    k_param, k_x = jax.random.split(key)
    params = init_params(k_param, input_dims, n_actions, spatial)
    prepped = prepare_params(params, input_dims, spatial)
    x = jax.random.normal(k_x, (batch, c_in, spatial, spatial), jnp.float32)

    out = forward(prepped, x, n_actions=n_actions)
    out = jax.block_until_ready(out)
    assert out.shape == (batch, n_actions), out.shape

    ref = jax.block_until_ready(forward_ref(params, x))
    # bf16 matmul inputs with f32 accumulation vs f32 reference.
    assert jnp.allclose(out, ref, rtol=2e-2, atol=2e-2), (
        float(jnp.max(jnp.abs(out - ref))))

    print("KERNEL_OK")
</pallas_src>

<mosaic_0001>
module attributes {stable_mosaic.version = 11 : i64} {
  func.func @_matmul_bias_kernel(%arg0: i32, %arg1: memref<162x256xbf16, #tpu.memory_space<vmem>>, %arg2: memref<256x128xbf16, #tpu.memory_space<vmem>>, %arg3: memref<1x128xf32, #tpu.memory_space<vmem>>, %arg4: memref<162x128xbf16, #tpu.memory_space<vmem>>) attributes {dimension_semantics = [#tpu.dimension_semantics<parallel>], iteration_bounds = array<i64: 1>, scalar_prefetch = 0 : i64, scratch_operands = 0 : i64, tpu.core_type = #tpu.core_type<tc>, window_params = [{transform_indices = @transform_0, window_bounds = array<i64: 162, 256>}, {pipeline_mode = #tpu.pipeline_mode<synchronous>, transform_indices = @transform_1, window_bounds = array<i64: 256, 128>}, {pipeline_mode = #tpu.pipeline_mode<synchronous>, transform_indices = @transform_2, window_bounds = array<i64: 1, 128>}, {transform_indices = @transform_3, window_bounds = array<i64: 162, 128>}]} {
    %c0 = arith.constant 0 : index
    %c0_0 = arith.constant 0 : index
    %0 = vector.load %arg1[%c0, %c0_0] : memref<162x256xbf16, #tpu.memory_space<vmem>>, vector<162x256xbf16>
    %c0_1 = arith.constant 0 : index
    %c0_2 = arith.constant 0 : index
    %1 = vector.load %arg2[%c0_1, %c0_2] : memref<256x128xbf16, #tpu.memory_space<vmem>>, vector<256x128xbf16>
    %cst = arith.constant dense<0.000000e+00> : vector<162x128xf32>
    %2 = tpu.matmul %0, %1, %cst {dimension_numbers = #tpu.dot_dimension_numbers<[1], [0], [0], [1], [0, 0, 1, 1], [], []>} : vector<162x256xbf16>, vector<256x128xbf16>, vector<162x128xf32> -> vector<162x128xf32>
    %c0_3 = arith.constant 0 : index
    %c0_4 = arith.constant 0 : index
    %3 = vector.load %arg3[%c0_3, %c0_4] : memref<1x128xf32, #tpu.memory_space<vmem>>, vector<1x128xf32>
    %4 = vector.broadcast %3 : vector<1x128xf32> to vector<162x128xf32>
    %5 = arith.addf %2, %4 : vector<162x128xf32>
    %cst_5 = arith.constant 0.000000e+00 : f32
    %6 = vector.broadcast %cst_5 : f32 to vector<162x128xf32>
    %7 = arith.maximumf %5, %6 : vector<162x128xf32>
    %8 = arith.truncf %7 : vector<162x128xf32> to vector<162x128xbf16>
    %c0_6 = arith.constant 0 : index
    %c0_7 = arith.constant 0 : index
    %9 = vector.load %arg4[%c0_6, %c0_7] : memref<162x128xbf16, #tpu.memory_space<vmem>>, vector<162x128xbf16>
    tpu.vector_store %arg4[%c0_6, %c0_7], %8 {strides = array<i32>} : memref<162x128xbf16, #tpu.memory_space<vmem>>, vector<162x128xbf16>,
    return
  }
  func.func @transform_0(%arg0: i32) -> (i32, i32) {
    %c0_i32 = arith.constant 0 : i32
    %c0_i32_0 = arith.constant 0 : i32
    return %arg0, %c0_i32 : i32, i32
  }
  func.func @transform_1(%arg0: i32) -> (i32, i32) {
    %c0_i32 = arith.constant 0 : i32
    %c0_i32_0 = arith.constant 0 : i32
    %c0_i32_1 = arith.constant 0 : i32
    return %c0_i32, %c0_i32_0 : i32, i32
  }
  func.func @transform_2(%arg0: i32) -> (i32, i32) {
    %c0_i32 = arith.constant 0 : i32
    %c0_i32_0 = arith.constant 0 : i32
    %c0_i32_1 = arith.constant 0 : i32
    return %c0_i32, %c0_i32_0 : i32, i32
  }
  func.func @transform_3(%arg0: i32) -> (i32, i32) {
    %c0_i32 = arith.constant 0 : i32
    %c0_i32_0 = arith.constant 0 : i32
    return %arg0, %c0_i32 : i32, i32
  }
}

module attributes {stable_mosaic.version = 11 : i64} {
  func.func @_matmul_bias_kernel(%arg0: i32, %arg1: memref<18x2048xbf16, #tpu.memory_space<vmem>>, %arg2: memref<2048x128xbf16, #tpu.memory_space<vmem>>, %arg3: memref<1x128xf32, #tpu.memory_space<vmem>>, %arg4: memref<18x128xbf16, #tpu.memory_space<vmem>>) attributes {dimension_semantics = [#tpu.dimension_semantics<parallel>], iteration_bounds = array<i64: 1>, scalar_prefetch = 0 : i64, scratch_operands = 0 : i64, tpu.core_type = #tpu.core_type<tc>, window_params = [{transform_indices = @transform_0, window_bounds = array<i64: 18, 2048>}, {pipeline_mode = #tpu.pipeline_mode<synchronous>, transform_indices = @transform_1, window_bounds = array<i64: 2048, 128>}, {pipeline_mode = #tpu.pipeline_mode<synchronous>, transform_indices = @transform_2, window_bounds = array<i64: 1, 128>}, {transform_indices = @transform_3, window_bounds = array<i64: 18, 128>}]} {
    %c0 = arith.constant 0 : index
    %c0_0 = arith.constant 0 : index
    %0 = vector.load %arg1[%c0, %c0_0] : memref<18x2048xbf16, #tpu.memory_space<vmem>>, vector<18x2048xbf16>
    %c0_1 = arith.constant 0 : index
    %c0_2 = arith.constant 0 : index
    %1 = vector.load %arg2[%c0_1, %c0_2] : memref<2048x128xbf16, #tpu.memory_space<vmem>>, vector<2048x128xbf16>
    %cst = arith.constant dense<0.000000e+00> : vector<18x128xf32>
    %2 = tpu.matmul %0, %1, %cst {dimension_numbers = #tpu.dot_dimension_numbers<[1], [0], [0], [1], [0, 0, 1, 1], [], []>} : vector<18x2048xbf16>, vector<2048x128xbf16>, vector<18x128xf32> -> vector<18x128xf32>
    %c0_3 = arith.constant 0 : index
    %c0_4 = arith.constant 0 : index
    %3 = vector.load %arg3[%c0_3, %c0_4] : memref<1x128xf32, #tpu.memory_space<vmem>>, vector<1x128xf32>
    %4 = vector.broadcast %3 : vector<1x128xf32> to vector<18x128xf32>
    %5 = arith.addf %2, %4 : vector<18x128xf32>
    %cst_5 = arith.constant 0.000000e+00 : f32
    %6 = vector.broadcast %cst_5 : f32 to vector<18x128xf32>
    %7 = arith.maximumf %5, %6 : vector<18x128xf32>
    %8 = arith.truncf %7 : vector<18x128xf32> to vector<18x128xbf16>
    %c0_6 = arith.constant 0 : index
    %c0_7 = arith.constant 0 : index
    %9 = vector.load %arg4[%c0_6, %c0_7] : memref<18x128xbf16, #tpu.memory_space<vmem>>, vector<18x128xbf16>
    tpu.vector_store %arg4[%c0_6, %c0_7], %8 {strides = array<i32>} : memref<18x128xbf16, #tpu.memory_space<vmem>>, vector<18x128xbf16>,
    return
  }
  func.func @transform_0(%arg0: i32) -> (i32, i32) {
    %c0_i32 = arith.constant 0 : i32
    %c0_i32_0 = arith.constant 0 : i32
    return %arg0, %c0_i32 : i32, i32
  }
  func.func @transform_1(%arg0: i32) -> (i32, i32) {
    %c0_i32 = arith.constant 0 : i32
    %c0_i32_0 = arith.constant 0 : i32
    %c0_i32_1 = arith.constant 0 : i32
    return %c0_i32, %c0_i32_0 : i32, i32
  }
  func.func @transform_2(%arg0: i32) -> (i32, i32) {
    %c0_i32 = arith.constant 0 : i32
    %c0_i32_0 = arith.constant 0 : i32
    %c0_i32_1 = arith.constant 0 : i32
    return %c0_i32, %c0_i32_0 : i32, i32
  }
  func.func @transform_3(%arg0: i32) -> (i32, i32) {
    %c0_i32 = arith.constant 0 : i32
    %c0_i32_0 = arith.constant 0 : i32
    return %arg0, %c0_i32 : i32, i32
  }
}

module attributes {stable_mosaic.version = 11 : i64} {
  func.func @_matmul_bias_kernel(%arg0: i32, %arg1: memref<2x1152xbf16, #tpu.memory_space<vmem>>, %arg2: memref<1152x128xbf16, #tpu.memory_space<vmem>>, %arg3: memref<1x128xf32, #tpu.memory_space<vmem>>, %arg4: memref<2x128xbf16, #tpu.memory_space<vmem>>) attributes {dimension_semantics = [#tpu.dimension_semantics<parallel>], iteration_bounds = array<i64: 1>, scalar_prefetch = 0 : i64, scratch_operands = 0 : i64, tpu.core_type = #tpu.core_type<tc>, window_params = [{transform_indices = @transform_0, window_bounds = array<i64: 2, 1152>}, {pipeline_mode = #tpu.pipeline_mode<synchronous>, transform_indices = @transform_1, window_bounds = array<i64: 1152, 128>}, {pipeline_mode = #tpu.pipeline_mode<synchronous>, transform_indices = @transform_2, window_bounds = array<i64: 1, 128>}, {transform_indices = @transform_3, window_bounds = array<i64: 2, 128>}]} {
    %c0 = arith.constant 0 : index
    %c0_0 = arith.constant 0 : index
    %0 = vector.load %arg1[%c0, %c0_0] : memref<2x1152xbf16, #tpu.memory_space<vmem>>, vector<2x1152xbf16>
    %c0_1 = arith.constant 0 : index
    %c0_2 = arith.constant 0 : index
    %1 = vector.load %arg2[%c0_1, %c0_2] : memref<1152x128xbf16, #tpu.memory_space<vmem>>, vector<1152x128xbf16>
    %cst = arith.constant dense<0.000000e+00> : vector<2x128xf32>
    %2 = tpu.matmul %0, %1, %cst {dimension_numbers = #tpu.dot_dimension_numbers<[1], [0], [0], [1], [0, 0, 1, 1], [], []>} : vector<2x1152xbf16>, vector<1152x128xbf16>, vector<2x128xf32> -> vector<2x128xf32>
    %c0_3 = arith.constant 0 : index
    %c0_4 = arith.constant 0 : index
    %3 = vector.load %arg3[%c0_3, %c0_4] : memref<1x128xf32, #tpu.memory_space<vmem>>, vector<1x128xf32>
    %4 = vector.broadcast %3 : vector<1x128xf32> to vector<2x128xf32>
    %5 = arith.addf %2, %4 : vector<2x128xf32>
    %cst_5 = arith.constant 0.000000e+00 : f32
    %6 = vector.broadcast %cst_5 : f32 to vector<2x128xf32>
    %7 = arith.maximumf %5, %6 : vector<2x128xf32>
    %8 = arith.truncf %7 : vector<2x128xf32> to vector<2x128xbf16>
    %c0_6 = arith.constant 0 : index
    %c0_7 = arith.constant 0 : index
    %9 = vector.load %arg4[%c0_6, %c0_7] : memref<2x128xbf16, #tpu.memory_space<vmem>>, vector<2x128xbf16>
    tpu.vector_store %arg4[%c0_6, %c0_7], %8 {strides = array<i32>} : memref<2x128xbf16, #tpu.memory_space<vmem>>, vector<2x128xbf16>,
    return
  }
  func.func @transform_0(%arg0: i32) -> (i32, i32) {
    %c0_i32 = arith.constant 0 : i32
    %c0_i32_0 = arith.constant 0 : i32
    return %arg0, %c0_i32 : i32, i32
  }
  func.func @transform_1(%arg0: i32) -> (i32, i32) {
    %c0_i32 = arith.constant 0 : i32
    %c0_i32_0 = arith.constant 0 : i32
    %c0_i32_1 = arith.constant 0 : i32
    return %c0_i32, %c0_i32_0 : i32, i32
  }
  func.func @transform_2(%arg0: i32) -> (i32, i32) {
    %c0_i32 = arith.constant 0 : i32
    %c0_i32_0 = arith.constant 0 : i32
    %c0_i32_1 = arith.constant 0 : i32
    return %c0_i32, %c0_i32_0 : i32, i32
  }
  func.func @transform_3(%arg0: i32) -> (i32, i32) {
    %c0_i32 = arith.constant 0 : i32
    %c0_i32_0 = arith.constant 0 : i32
    return %arg0, %c0_i32 : i32, i32
  }
}

module attributes {stable_mosaic.version = 11 : i64} {
  func.func @_fc_head_kernel(%arg0: i32, %arg1: memref<2x128xbf16, #tpu.memory_space<vmem>>, %arg2: memref<128x512xbf16, #tpu.memory_space<vmem>>, %arg3: memref<1x512xf32, #tpu.memory_space<vmem>>, %arg4: memref<512x128xbf16, #tpu.memory_space<vmem>>, %arg5: memref<1x128xf32, #tpu.memory_space<vmem>>, %arg6: memref<2x128xf32, #tpu.memory_space<vmem>>) attributes {dimension_semantics = [#tpu.dimension_semantics<arbitrary>], iteration_bounds = array<i64: 1>, scalar_prefetch = 0 : i64, scratch_operands = 0 : i64, tpu.core_type = #tpu.core_type<tc>, window_params = [{pipeline_mode = #tpu.pipeline_mode<synchronous>, transform_indices = @transform_0, window_bounds = array<i64: 2, 128>}, {pipeline_mode = #tpu.pipeline_mode<synchronous>, transform_indices = @transform_1, window_bounds = array<i64: 128, 512>}, {pipeline_mode = #tpu.pipeline_mode<synchronous>, transform_indices = @transform_2, window_bounds = array<i64: 1, 512>}, {pipeline_mode = #tpu.pipeline_mode<synchronous>, transform_indices = @transform_3, window_bounds = array<i64: 512, 128>}, {pipeline_mode = #tpu.pipeline_mode<synchronous>, transform_indices = @transform_4, window_bounds = array<i64: 1, 128>}, {pipeline_mode = #tpu.pipeline_mode<synchronous>, transform_indices = @transform_5, window_bounds = array<i64: 2, 128>}]} {
    %c0 = arith.constant 0 : index
    %c0_0 = arith.constant 0 : index
    %0 = vector.load %arg1[%c0, %c0_0] : memref<2x128xbf16, #tpu.memory_space<vmem>>, vector<2x128xbf16>
    %c0_1 = arith.constant 0 : index
    %c0_2 = arith.constant 0 : index
    %1 = vector.load %arg2[%c0_1, %c0_2] : memref<128x512xbf16, #tpu.memory_space<vmem>>, vector<128x512xbf16>
    %cst = arith.constant dense<0.000000e+00> : vector<2x512xf32>
    %2 = tpu.matmul %0, %1, %cst {dimension_numbers = #tpu.dot_dimension_numbers<[1], [0], [0], [1], [0, 0, 1, 1], [], []>} : vector<2x128xbf16>, vector<128x512xbf16>, vector<2x512xf32> -> vector<2x512xf32>
    %c0_3 = arith.constant 0 : index
    %c0_4 = arith.constant 0 : index
    %3 = vector.load %arg3[%c0_3, %c0_4] : memref<1x512xf32, #tpu.memory_space<vmem>>, vector<1x512xf32>
    %4 = vector.broadcast %3 : vector<1x512xf32> to vector<2x512xf32>
    %5 = arith.addf %2, %4 : vector<2x512xf32>
    %cst_5 = arith.constant 0.000000e+00 : f32
    %6 = vector.broadcast %cst_5 : f32 to vector<2x512xf32>
    %7 = arith.maximumf %5, %6 : vector<2x512xf32>
    %8 = arith.truncf %7 : vector<2x512xf32> to vector<2x512xbf16>
    %c0_6 = arith.constant 0 : index
    %c0_7 = arith.constant 0 : index
    %9 = vector.load %arg4[%c0_6, %c0_7] : memref<512x128xbf16, #tpu.memory_space<vmem>>, vector<512x128xbf16>
    %cst_8 = arith.constant dense<0.000000e+00> : vector<2x128xf32>
    %10 = tpu.matmul %8, %9, %cst_8 {dimension_numbers = #tpu.dot_dimension_numbers<[1], [0], [0], [1], [0, 0, 1, 1], [], []>} : vector<2x512xbf16>, vector<512x128xbf16>, vector<2x128xf32> -> vector<2x128xf32>
    %c0_9 = arith.constant 0 : index
    %c0_10 = arith.constant 0 : index
    %11 = vector.load %arg5[%c0_9, %c0_10] : memref<1x128xf32, #tpu.memory_space<vmem>>, vector<1x128xf32>
    %12 = vector.broadcast %11 : vector<1x128xf32> to vector<2x128xf32>
    %13 = arith.addf %10, %12 : vector<2x128xf32>
    %c0_11 = arith.constant 0 : index
    %c0_12 = arith.constant 0 : index
    %14 = vector.load %arg6[%c0_11, %c0_12] : memref<2x128xf32, #tpu.memory_space<vmem>>, vector<2x128xf32>
    tpu.vector_store %arg6[%c0_11, %c0_12], %13 {strides = array<i32>} : memref<2x128xf32, #tpu.memory_space<vmem>>, vector<2x128xf32>,
    return
  }
  func.func @transform_0(%arg0: i32) -> (i32, i32) {
    %c0_i32 = arith.constant 0 : i32
    %c0_i32_0 = arith.constant 0 : i32
    %c0_i32_1 = arith.constant 0 : i32
    return %c0_i32, %c0_i32_0 : i32, i32
  }
  func.func @transform_1(%arg0: i32) -> (i32, i32) {
    %c0_i32 = arith.constant 0 : i32
    %c0_i32_0 = arith.constant 0 : i32
    %c0_i32_1 = arith.constant 0 : i32
    return %c0_i32, %c0_i32_0 : i32, i32
  }
  func.func @transform_2(%arg0: i32) -> (i32, i32) {
    %c0_i32 = arith.constant 0 : i32
    %c0_i32_0 = arith.constant 0 : i32
    %c0_i32_1 = arith.constant 0 : i32
    return %c0_i32, %c0_i32_0 : i32, i32
  }
  func.func @transform_3(%arg0: i32) -> (i32, i32) {
    %c0_i32 = arith.constant 0 : i32
    %c0_i32_0 = arith.constant 0 : i32
    %c0_i32_1 = arith.constant 0 : i32
    return %c0_i32, %c0_i32_0 : i32, i32
  }
  func.func @transform_4(%arg0: i32) -> (i32, i32) {
    %c0_i32 = arith.constant 0 : i32
    %c0_i32_0 = arith.constant 0 : i32
    %c0_i32_1 = arith.constant 0 : i32
    return %c0_i32, %c0_i32_0 : i32, i32
  }
  func.func @transform_5(%arg0: i32) -> (i32, i32) {
    %c0_i32 = arith.constant 0 : i32
    %c0_i32_0 = arith.constant 0 : i32
    %c0_i32_1 = arith.constant 0 : i32
    return %c0_i32, %c0_i32_0 : i32, i32
  }
}

</mosaic_0001>

<bundles_post_ra>
// kernel: forward.4
= control target key start
LH: loop header
LB: loop body
LE: loop exit
PB: predicated region body
PF: predicated region fallthrough
CT: control target
= control target key end

     0   :  { %s1005_s1 = inlined_call_operand.vmem [shape: bf16[256,128], index: 1, kind: input, shape index: {}]   ;;  %s1006_s0 = inlined_call_operand.vmem [shape: bf16[162,256], index: 0, kind: input, shape index: {}]   ;;  %s1007_s2 = inlined_call_operand.vmem [shape: f32[1,128], index: 2, kind: input, shape index: {}]   ;;  %s1008_s3 = inlined_call_operand.vmem [shape: bf16[162,128], index: 3, kind: output, shape index: {}]  }
   0x1   :  { %v767_v0 = vld [vmem:[%s1005_s1 + $0x40] sm:$0xff]   ;;  %v769_v2 = vld [vmem:[%s1005_s1 + $0x48] sm:$0xff]   ;;  %v771_v4 = vld [vmem:[%s1005_s1 + $0x50] sm:$0xff]  }
   0x2   :  { %v768_v1 = vld [vmem:[%s1005_s1] sm:$0xff]   ;;  %669 = vmatprep.subr.bf16.mxu0 %v767_v0  ;;  %751 = vmatprep.subr.bf16.mxu1 %v767_v0  ;;  %v770_v3 = vld [vmem:[%s1005_s1 + $0x8] sm:$0xff]   ;;  %v772_v5 = vld [vmem:[%s1005_s1 + $0x10] sm:$0xff]  }
   0x3   :  { %670 = vmatpush3.bf16.msra.mxu0 %v768_v1  ;;  %759 = vmatpush3.bf16.msra.mxu1 %v768_v1  ;;  %v773_v6 = vld [vmem:[%s1005_s1 + $0x58] sm:$0xff]   ;;  %v775_v8 = vld [vmem:[%s1005_s1 + $0x60] sm:$0xff]   ;;  %v777_v10 = vld [vmem:[%s1005_s1 + $0x68] sm:$0xff]  }
   0x4   :  { %671 = vmatprep.subr.bf16.mxu0 %v769_v2  ;;  %752 = vmatprep.subr.bf16.mxu1 %v769_v2  ;;  %v774_v7 = vld [vmem:[%s1005_s1 + $0x18] sm:$0xff]   ;;  %v776_v9 = vld [vmem:[%s1005_s1 + $0x20] sm:$0xff]   ;;  %v778_v13 = vld [vmem:[%s1005_s1 + $0x28] sm:$0xff]  }
   0x5   :  { %v785_v11 = vld [vmem:[%s1006_s0 + $0x4] ss:$8 sps:$4 sm:$0xff]   ;;  %v779_v14 = vld [vmem:[%s1005_s1 + $0x70] sm:$0xff]   ;;  %v781_v16 = vld [vmem:[%s1005_s1 + $0x78] sm:$0xff]  }
   0x6   :  { %v788_v12 = vld [vmem:[%s1006_s0 + $0x64] ss:$8 sps:$4 sm:$0xff]   ;;  %310 = vmatprep.mubr.bf16.mxu0 %v785_v11  ;;  %v780_v15 = vld [vmem:[%s1005_s1 + $0x30] sm:$0xff]   ;;  %v782_v17 = vld [vmem:[%s1005_s1 + $0x38] sm:$0xff]  }
   0x7   :  { %672 = vmatpush3.bf16.msra.mxu0 %v770_v3  ;;  %760 = vmatpush3.bf16.msra.mxu1 %v770_v3  ;;  %v783_v18 = vld [vmem:[%s1006_s0] ss:$8 sps:$4 sm:$0xff]   ;;  %v789_v20 = vld [vmem:[%s1006_s0 + $0x14] ss:$8 sps:$4 sm:$0xff]   ;;  %v791_v22 = vld [vmem:[%s1006_s0 + $0x10] ss:$8 sps:$4 sm:$0xff]  }
   0x8   :  { %673 = vmatprep.subr.bf16.mxu0 %v771_v4  ;;  %753 = vmatprep.subr.bf16.mxu1 %v771_v4  ;;  %v786_v19 = vld [vmem:[%s1006_s0 + $0x60] ss:$8 sps:$4 sm:$0xff]   ;;  %v792_v21 = vld [vmem:[%s1006_s0 + $0x74] ss:$8 sps:$4 sm:$0xff]   ;;  %v796_v23 = vld [vmem:[%s1006_s0 + $0x70] ss:$8 sps:$4 sm:$0xff]  }
   0x9   :  { %358 = vmatprep.mubr.bf16.mxu1 %v788_v12  ;;  %v794_v24 = vld [vmem:[%s1006_s0 + $0x24] ss:$8 sps:$4 sm:$0xff]   ;;  %v797_v26 = vld [vmem:[%s1006_s0 + $0x20] ss:$8 sps:$4 sm:$0xff]   ;;  %v800_v28 = vld [vmem:[%s1006_s0 + $0x34] ss:$8 sps:$4 sm:$0xff]  }
   0xa   :  { %v798_v25 = vld [vmem:[%s1006_s0 + $0x84] ss:$8 sps:$4 sm:$0xff]   ;;  %v802_v27 = vld [vmem:[%s1006_s0 + $0x80] ss:$8 sps:$4 sm:$0xff]   ;;  %v804_v29 = vld [vmem:[%s1006_s0 + $0x94] ss:$8 sps:$4 sm:$0xff]  }
   0xb   :  { %674 = vmatpush3.bf16.msra.mxu0 %v772_v5  ;;  %761 = vmatpush3.bf16.msra.mxu1 %v772_v5  ;;  %v35_v30 = vld [vmem:[%s1006_s0 + $0xa0] sm:$0x11]  ;;  %v803_v31 = vld [vmem:[%s1006_s0 + $0x30] ss:$8 sps:$4 sm:$0xff]   ;;  %v811_v37 = vld [vmem:[%s1006_s0 + $0x54] ss:$8 sps:$4 sm:$0xff]  }
   0xc   :  { %675 = vmatprep.subr.bf16.mxu0 %v773_v6  ;;  %754 = vmatprep.subr.bf16.mxu1 %v773_v6  ;;  %v808_v32 = vld [vmem:[%s1006_s0 + $0x90] ss:$8 sps:$4 sm:$0xff]   ;;  %v806_v33 = vld [vmem:[%s1006_s0 + $0x44] ss:$8 sps:$4 sm:$0xff]   ;;  %v551_v34 = vcombine.high %v35_v30, %v35_v30  ;;  %v809_v35 = vld [vmem:[%s1006_s0 + $0x40] ss:$8 sps:$4 sm:$0xff]   ;;  %v550_v36 = vcombine.low %v35_v30, %v35_v30 }
   0xd   :  { %v814_v38 = vld [vmem:[%s1006_s0 + $0x50] ss:$8 sps:$4 sm:$0xff]   ;;  %v949_v41 = vld [vmem:[%s1007_s2] ss:$0 sm:$0xff] }
   0xf   :  { %676 = vmatpush3.bf16.msra.mxu0 %v774_v7  ;;  %762 = vmatpush3.bf16.msra.mxu1 %v774_v7 }
  0x10   :  { %677 = vmatprep.subr.bf16.mxu0 %v775_v8  ;;  %755 = vmatprep.subr.bf16.mxu1 %v775_v8 }
  0x13   :  { %678 = vmatpush3.bf16.msra.mxu0 %v776_v9  ;;  %763 = vmatpush3.bf16.msra.mxu1 %v776_v9 }
  0x14   :  { %679 = vmatprep.subr.bf16.mxu0 %v777_v10  ;;  %756 = vmatprep.subr.bf16.mxu1 %v777_v10 }
  0x17   :  { %680 = vmatpush3.bf16.msra.mxu0 %v778_v13  ;;  %764 = vmatpush3.bf16.msra.mxu1 %v778_v13 }
  0x18   :  { %681 = vmatprep.subr.bf16.mxu0 %v779_v14  ;;  %757 = vmatprep.subr.bf16.mxu1 %v779_v14 }
  0x1b   :  { %682 = vmatpush3.bf16.msra.mxu0 %v780_v15  ;;  %765 = vmatpush3.bf16.msra.mxu1 %v780_v15 }
  0x1c   :  { %683 = vmatprep.subr.bf16.mxu0 %v781_v16  ;;  %758 = vmatprep.subr.bf16.mxu1 %v781_v16 }
  0x1f   :  { %684 = vmatpush3.bf16.msra.mxu0 %v782_v17  ;;  %766 = vmatpush3.bf16.msra.mxu1 %v782_v17 }
  0x22   :  { %311 = vmatmul.mubr.bf16.vlgmr.msra.gmra.mrb[0].mxu0 %v783_v18  ;;  %359 = vmatmul.mubr.bf16.vlgmr.msra.gmra.mrb[0].mxu1 %v786_v19 }
  0x23   :  { %318 = vmatprep.mubr.bf16.mxu0 %v789_v20  ;;  %366 = vmatprep.mubr.bf16.mxu1 %v792_v21 }
  0x2a   :  { %319 = vmatmul.mubr.bf16.gmra.mrb[4].mxu0 %v791_v22  ;;  %367 = vmatmul.mubr.bf16.gmra.mrb[4].mxu1 %v796_v23 }
  0x2b   :  { %326 = vmatprep.mubr.bf16.mxu0 %v794_v24  ;;  %374 = vmatprep.mubr.bf16.mxu1 %v798_v25 }
  0x32   :  { %327 = vmatmul.mubr.bf16.gmra.mrb[8].mxu0 %v797_v26  ;;  %375 = vmatmul.mubr.bf16.gmra.mrb[8].mxu1 %v802_v27 }
  0x33   :  { %334 = vmatprep.mubr.bf16.mxu0 %v800_v28  ;;  %382 = vmatprep.mubr.bf16.mxu1 %v804_v29 }
  0x3a   :  { %335 = vmatmul.mubr.bf16.gmra.mrb[12].mxu0 %v803_v31  ;;  %383 = vmatmul.mubr.bf16.gmra.mrb[12].mxu1 %v808_v32 }
  0x3b   :  { %342 = vmatprep.mubr.bf16.mxu0 %v806_v33  ;;  %390 = vmatprep.mubr.bf16.mxu1 %v551_v34 }
  0x42   :  { %343 = vmatmul.mubr.bf16.gmra.mrb[16].mxu0 %v809_v35  ;;  %391 = vmatmul.mubr.bf16.gmra.mrb[16].mxu1 %v550_v36 }
  0x43   :  { %350 = vmatprep.mubr.bf16.mxu0 %v811_v37 }
  0x4a   :  { %351 = vmatmul.mubr.bf16.gmra.mrb[20].mxu0 %v814_v38 }
  0xf5   :  { %v685_v39 = vpop.f32.mrb[0].mxu0  ;;  %v721_v40 = vpop.f32.mrb[0].mxu1 }
  0xf6   :  { %v686_v42 = vpop.f32.mrb[1].mxu0  ;;  %v722_v43 = vpop.f32.mrb[1].mxu1 }
  0xf7   :  { %v687_v44 = vadd.f32 %v686_v42, %v685_v39  ;;  %v688_v45 = vpop.f32.mrb[2].mxu0  ;;  %v723_v46 = vadd.f32 %v722_v43, %v721_v40  ;;  %v724_v47 = vpop.f32.mrb[2].mxu1 }
  0xf8   :  { %v689_v48 = vpop.f32.mrb[3].mxu0  ;;  %v725_v49 = vpop.f32.mrb[3].mxu1 }
  0xf9   :  { %v313_v50 = vadd.f32 %v687_v44, %v949_v41  ;;  %v690_v51 = vadd.f32 %v689_v48, %v688_v45  ;;  %v361_v52 = vadd.f32 %v723_v46, %v949_v41  ;;  %v726_v53 = vadd.f32 %v725_v49, %v724_v47 }
  0xfb   :  { %v316_v54 = vadd.f32 %v690_v51, %v949_v41  ;;  %v410_v55 = vmax.f32 %v361_v52, 0.0  ;;  %v364_v56 = vadd.f32 %v726_v53, %v949_v41  ;;  %v398_v57 = vmax.f32 %v313_v50, 0.0 }
  0xfd   :  { %v399_v58 = vmax.f32 %v316_v54, 0.0  ;;  %v691_v59 = vpop.f32.mrb[4].mxu0  ;;  %v411_v60 = vmax.f32 %v364_v56, 0.0  ;;  %v727_v61 = vpop.f32.mrb[4].mxu1 }
  0xfe   :  { %v692_v62 = vpop.f32.mrb[5].mxu0  ;;  %v728_v63 = vpop.f32.mrb[5].mxu1 }
  0xff   :  { %v613_v0 = vpack.c.bf16 %v399_v58, %v398_v57  ;;  %v693_v1 = vadd.f32 %v692_v62, %v691_v59  ;;  %v694_v2 = vpop.f32.mrb[6].mxu0  ;;  %v643_v3 = vpack.c.bf16 %v411_v60, %v410_v55  ;;  %v729_v4 = vadd.f32 %v728_v63, %v727_v61  ;;  %v730_v5 = vpop.f32.mrb[6].mxu1 }
 0x100   :  { %v695_v6 = vpop.f32.mrb[7].mxu0  ;;  %v731_v7 = vpop.f32.mrb[7].mxu1 }
 0x101   :  { %614 = vst [vmem:[%s1008_s3] sm:$0xff] %v613_v0   ;;  %v321_v8 = vadd.f32 %v693_v1, %v949_v41  ;;  %665 = vst [vmem:[%s1008_s3 + $0x30] sm:$0xff] %v643_v3   ;;  %v696_v9 = vadd.f32 %v695_v6, %v694_v2  ;;  %v369_v10 = vadd.f32 %v729_v4, %v949_v41 }
 0x102   :  { %v732_v11 = vadd.f32 %v731_v7, %v730_v5 }
 0x103   :  { %v324_v12 = vadd.f32 %v696_v9, %v949_v41  ;;  %v412_v13 = vmax.f32 %v369_v10, 0.0  ;;  %v400_v15 = vmax.f32 %v321_v8, 0.0 }
 0x104   :  { %v372_v14 = vadd.f32 %v732_v11, %v949_v41 }
 0x105   :  { %v401_v16 = vmax.f32 %v324_v12, 0.0  ;;  %v697_v17 = vpop.f32.mrb[8].mxu0  ;;  %v733_v19 = vpop.f32.mrb[8].mxu1 }
 0x106   :  { %v413_v18 = vmax.f32 %v372_v14, 0.0  ;;  %v698_v20 = vpop.f32.mrb[9].mxu0  ;;  %v734_v21 = vpop.f32.mrb[9].mxu1 }
 0x107   :  { %v618_v22 = vpack.c.bf16 %v401_v16, %v400_v15  ;;  %v699_v23 = vadd.f32 %v698_v20, %v697_v17  ;;  %v700_v24 = vpop.f32.mrb[10].mxu0  ;;  %v735_v26 = vadd.f32 %v734_v21, %v733_v19  ;;  %v736_v27 = vpop.f32.mrb[10].mxu1 }
 0x108   :  { %v648_v25 = vpack.c.bf16 %v413_v18, %v412_v13  ;;  %v701_v28 = vpop.f32.mrb[11].mxu0  ;;  %v737_v29 = vpop.f32.mrb[11].mxu1 }
 0x109   :  { %660 = vst [vmem:[%s1008_s3 + $0x8] sm:$0xff] %v618_v22   ;;  %v329_v30 = vadd.f32 %v699_v23, %v949_v41  ;;  %v702_v31 = vadd.f32 %v701_v28, %v700_v24  ;;  %v377_v32 = vadd.f32 %v735_v26, %v949_v41  ;;  %v738_v33 = vadd.f32 %v737_v29, %v736_v27 }
 0x10a   :  { %666 = vst [vmem:[%s1008_s3 + $0x38] sm:$0xff] %v648_v25  }
 0x10b   :  { %v332_v34 = vadd.f32 %v702_v31, %v949_v41  ;;  %v414_v35 = vmax.f32 %v377_v32, 0.0  ;;  %v380_v36 = vadd.f32 %v738_v33, %v949_v41  ;;  %v402_v37 = vmax.f32 %v329_v30, 0.0 }
 0x10d   :  { %v403_v38 = vmax.f32 %v332_v34, 0.0  ;;  %v703_v39 = vpop.f32.mrb[12].mxu0  ;;  %v415_v40 = vmax.f32 %v380_v36, 0.0  ;;  %v739_v42 = vpop.f32.mrb[12].mxu1 }
 0x10e   :  { %v704_v43 = vpop.f32.mrb[13].mxu0  ;;  %v740_v44 = vpop.f32.mrb[13].mxu1 }
 0x10f   :  { %v623_v45 = vpack.c.bf16 %v403_v38, %v402_v37  ;;  %v705_v46 = vadd.f32 %v704_v43, %v703_v39  ;;  %v706_v47 = vpop.f32.mrb[14].mxu0  ;;  %v653_v48 = vpack.c.bf16 %v415_v40, %v414_v35  ;;  %v741_v49 = vadd.f32 %v740_v44, %v739_v42  ;;  %v742_v50 = vpop.f32.mrb[14].mxu1 }
 0x110   :  { %v707_v51 = vpop.f32.mrb[15].mxu0  ;;  %v743_v52 = vpop.f32.mrb[15].mxu1 }
 0x111   :  { %661 = vst [vmem:[%s1008_s3 + $0x10] sm:$0xff] %v623_v45   ;;  %v337_v53 = vadd.f32 %v705_v46, %v949_v41  ;;  %667 = vst [vmem:[%s1008_s3 + $0x40] sm:$0xff] %v653_v48   ;;  %v708_v54 = vadd.f32 %v707_v51, %v706_v47  ;;  %v385_v55 = vadd.f32 %v741_v49, %v949_v41 }
 0x112   :  { %v744_v56 = vadd.f32 %v743_v52, %v742_v50 }
 0x113   :  { %v340_v57 = vadd.f32 %v708_v54, %v949_v41  ;;  %v416_v58 = vmax.f32 %v385_v55, 0.0  ;;  %v404_v60 = vmax.f32 %v337_v53, 0.0 }
 0x114   :  { %v388_v59 = vadd.f32 %v744_v56, %v949_v41 }
 0x115   :  { %v405_v61 = vmax.f32 %v340_v57, 0.0  ;;  %v709_v62 = vpop.f32.mrb[16].mxu0  ;;  %v745_v0 = vpop.f32.mrb[16].mxu1 }
 0x116   :  { %v417_v63 = vmax.f32 %v388_v59, 0.0  ;;  %v710_v1 = vpop.f32.mrb[17].mxu0  ;;  %v746_v2 = vpop.f32.mrb[17].mxu1 }
 0x117   :  { %v628_v3 = vpack.c.bf16 %v405_v61, %v404_v60  ;;  %v711_v4 = vadd.f32 %v710_v1, %v709_v62  ;;  %v712_v5 = vpop.f32.mrb[18].mxu0  ;;  %v747_v7 = vadd.f32 %v746_v2, %v745_v0  ;;  %v748_v8 = vpop.f32.mrb[18].mxu1 }
 0x118   :  { %v658_v6 = vpack.c.bf16 %v417_v63, %v416_v58  ;;  %v713_v9 = vpop.f32.mrb[19].mxu0  ;;  %v749_v10 = vpop.f32.mrb[19].mxu1 }
 0x119   :  { %662 = vst [vmem:[%s1008_s3 + $0x18] sm:$0xff] %v628_v3   ;;  %v345_v11 = vadd.f32 %v711_v4, %v949_v41  ;;  %v714_v12 = vadd.f32 %v713_v9, %v712_v5  ;;  %v393_v13 = vadd.f32 %v747_v7, %v949_v41 }
 0x11a   :  { %668 = vst [vmem:[%s1008_s3 + $0x48] sm:$0xff] %v658_v6  }
 0x11b   :  { %v348_v14 = vadd.f32 %v714_v12, %v949_v41  ;;  %v418_v15 = vmax.f32 %v393_v13, 0.0  ;;  %v406_v16 = vmax.f32 %v345_v11, 0.0 }
 0x11d   :  { %v407_v17 = vmax.f32 %v348_v14, 0.0  ;;  %v715_v18 = vpop.f32.mrb[20].mxu0  ;;  %v609_v19 = vpack.c.bf16 %v418_v15, %v418_v15 }
 0x11e   :  { %v716_v20 = vpop.f32.mrb[21].mxu0 }
 0x11f   :  { %v633_v21 = vpack.c.bf16 %v407_v17, %v406_v16  ;;  %524 = vst [vmem:[%s1008_s3 + $0x50] sm:$0x1] %v609_v19  ;;  %v717_v22 = vadd.f32 %v716_v20, %v715_v18  ;;  %v718_v23 = vpop.f32.mrb[22].mxu0 }
 0x120   :  { %v719_v24 = vpop.f32.mrb[23].mxu0 }
 0x121   :  { %663 = vst [vmem:[%s1008_s3 + $0x20] sm:$0xff] %v633_v21   ;;  %v353_v25 = vadd.f32 %v717_v22, %v949_v41  ;;  %v720_v26 = vadd.f32 %v719_v24, %v718_v23 }
 0x123   :  { %v356_v27 = vadd.f32 %v720_v26, %v949_v41  ;;  %v408_v28 = vmax.f32 %v353_v25, 0.0 }
 0x125   :  { %v409_v29 = vmax.f32 %v356_v27, 0.0 }
 0x127   :  { %v638_v30 = vpack.c.bf16 %v409_v29, %v408_v28 }
 0x129   :  { %664 = vst [vmem:[%s1008_s3 + $0x28] sm:$0xff] %v638_v30  }

// kernel: forward.6
= control target key start
LH: loop header
LB: loop body
LE: loop exit
PB: predicated region body
PF: predicated region fallthrough
CT: control target
= control target key end

     0   :  { %v1148_v21 = vmov 1966171168   ;;  %v174_v23 = vlaneseq  ;;  %vm1150_vm0 = vmmov 0   ;;  %s1413_s1 = inlined_call_operand.vmem [shape: bf16[1152,128], index: 1, kind: input, shape index: {}]   ;;  %s1414_s0 = inlined_call_operand.vmem [shape: bf16[2,1152], index: 0, kind: input, shape index: {}]   ;;  %s1415_s2 = inlined_call_operand.vmem [shape: f32[1,128], index: 2, kind: input, shape index: {}]   ;;  %s1416_s3 = inlined_call_operand.vmem [shape: bf16[2,128], index: 3, kind: output, shape index: {}]  }
   0x1   :  { %v1075_v0 = vld [vmem:[%s1413_s1 + $0x40] sm:$0xff]   ;;  %v1079_v4 = vld [vmem:[%s1413_s1 + $0x48] sm:$0xff]   ;;  %v1083_v8 = vld [vmem:[%s1413_s1 + $0x50] sm:$0xff]   ;;  %v172_v22 = vunpack.c.l.s4 %v1148_v21 }
   0x2   :  { %v1076_v1 = vld [vmem:[%s1413_s1] sm:$0xff]   ;;  %955 = vmatprep.subr.bf16.mxu0 %v1075_v0  ;;  %v1080_v5 = vld [vmem:[%s1413_s1 + $0x8] sm:$0xff]   ;;  %v1084_v9 = vld [vmem:[%s1413_s1 + $0x10] sm:$0xff]   ;;  %v175_v29 = vshrl.u32 %v174_v23, 7 }
   0x3   :  { %v1077_v2 = vld [vmem:[%s1413_s1 + $0xc0] sm:$0xff]   ;;  %956 = vmatpush3.bf16.msra.mxu0 %v1076_v1  ;;  %v1081_v6 = vld [vmem:[%s1413_s1 + $0xc8] sm:$0xff]   ;;  %v1085_v10 = vld [vmem:[%s1413_s1 + $0xd0] sm:$0xff]   ;;  %v173_v28 = vunpack.c.0.s8 %v172_v22 }
   0x4   :  { %v1078_v3 = vld [vmem:[%s1413_s1 + $0x80] sm:$0xff]   ;;  %977 = vmatprep.subr.bf16.mxu1 %v1077_v2  ;;  %957 = vmatprep.subr.bf16.mxu0 %v1079_v4  ;;  %v1082_v7 = vld [vmem:[%s1413_s1 + $0x88] sm:$0xff]   ;;  %v1086_v11 = vld [vmem:[%s1413_s1 + $0x90] sm:$0xff]  }
   0x5   :  { %978 = vmatpush3.bf16.msra.mxu1 %v1078_v3  ;;  %v1087_v12 = vld [vmem:[%s1413_s1 + $0x58] sm:$0xff]   ;;  %v1091_v16 = vld [vmem:[%s1413_s1 + $0x60] sm:$0xff]   ;;  %v1095_v20 = vld [vmem:[%s1413_s1 + $0x68] sm:$0xff]   ;;  %v1258_v34 = vsub.s32 %v173_v28, %v175_v29 }
   0x6   :  { %979 = vmatprep.subr.bf16.mxu1 %v1081_v6  ;;  %v1088_v13 = vld [vmem:[%s1413_s1 + $0x18] sm:$0xff]   ;;  %v1092_v17 = vld [vmem:[%s1413_s1 + $0x20] sm:$0xff]   ;;  %v1096_v24 = vld [vmem:[%s1413_s1 + $0x28] sm:$0xff]  }
   0x7   :  { %958 = vmatpush3.bf16.msra.mxu0 %v1080_v5  ;;  %v1089_v14 = vld [vmem:[%s1413_s1 + $0xd8] sm:$0xff]   ;;  %v1093_v18 = vld [vmem:[%s1413_s1 + $0xe0] sm:$0xff]   ;;  %v1097_v25 = vld [vmem:[%s1413_s1 + $0xe8] sm:$0xff]  }
   0x8   :  { %959 = vmatprep.subr.bf16.mxu0 %v1083_v8  ;;  %v1090_v15 = vld [vmem:[%s1413_s1 + $0x98] sm:$0xff]   ;;  %v1094_v19 = vld [vmem:[%s1413_s1 + $0xa0] sm:$0xff]   ;;  %v1098_v26 = vld [vmem:[%s1413_s1 + $0xa8] sm:$0xff]  }
   0x9   :  { %980 = vmatpush3.bf16.msra.mxu1 %v1082_v7  ;;  %v1099_v27 = vld [vmem:[%s1413_s1 + $0x70] sm:$0xff]   ;;  %v1103_v33 = vld [vmem:[%s1413_s1 + $0x78] sm:$0xff]   ;;  %v15_v37 = vld [vmem:[%s1414_s0] sm:$0xff] }
   0xa   :  { %981 = vmatprep.subr.bf16.mxu1 %v1085_v10  ;;  %v1100_v30 = vld [vmem:[%s1413_s1 + $0x30] sm:$0xff]   ;;  %v1104_v35 = vld [vmem:[%s1413_s1 + $0x38] sm:$0xff]   ;;  %v170_v38 = vcombine.high %v15_v37, %v15_v37  ;;  %v177_v39 = vrot.slane %v15_v37, %v1258_v34  ;;  %v1108_v41 = vld [vmem:[%s1413_s1 + $0x140] sm:$0xff]  }
   0xb   :  { %960 = vmatpush3.bf16.msra.mxu0 %v1084_v9  ;;  %v1101_v31 = vld [vmem:[%s1413_s1 + $0xf0] sm:$0xff]   ;;  %v1105_v36 = vld [vmem:[%s1413_s1 + $0xf8] sm:$0xff]   ;;  %v1110_v45 = vld [vmem:[%s1413_s1 + $0x1c0] sm:$0xff]  }
   0xc   :  { %961 = vmatprep.subr.bf16.mxu0 %v1087_v12  ;;  %v1102_v32 = vld [vmem:[%s1413_s1 + $0xb0] sm:$0xff]   ;;  %v1107_v40 = vld [vmem:[%s1413_s1 + $0xb8] sm:$0xff]   ;;  %v185_v42 = vcombine.high %v177_v39, %v177_v39  ;;  %v193_v43 = vrot.slane %v177_v39, %v1258_v34  ;;  %v1278_v44 = vrot.slane %v170_v38, %v1258_v34  ;;  %v1109_v47 = vld [vmem:[%s1413_s1 + $0x100] sm:$0xff]  }
   0xd   :  { %982 = vmatpush3.bf16.msra.mxu1 %v1086_v11  ;;  %v1112_v50 = vld [vmem:[%s1413_s1 + $0x148] sm:$0xff]   ;;  %v1111_v52 = vld [vmem:[%s1413_s1 + $0x180] sm:$0xff]   ;;  %v1116_v57 = vld [vmem:[%s1413_s1 + $0x150] sm:$0xff]  }
   0xe   :  { %983 = vmatprep.subr.bf16.mxu1 %v1089_v14  ;;  %v207_v46 = vrot.slane %v185_v42, %v1258_v34  ;;  %v186_v48 = vcombine.high %v1278_v44, %v1278_v44  ;;  %v215_v49 = vcombine.high %v193_v43, %v193_v43  ;;  %v1114_v54 = vld [vmem:[%s1413_s1 + $0x1c8] sm:$0xff]   ;;  %v1118_v59 = vld [vmem:[%s1413_s1 + $0x1d0] sm:$0xff]   ;;  %v1120_v61 = vld [vmem:[%s1413_s1 + $0x158] sm:$0xff]  }
   0xf   :  { %962 = vmatpush3.bf16.msra.mxu0 %v1088_v13  ;;  %v1113_v55 = vld [vmem:[%s1413_s1 + $0x108] sm:$0xff]   ;;  %v1117_v60 = vld [vmem:[%s1413_s1 + $0x110] sm:$0xff]   ;;  %v1122_v63 = vld [vmem:[%s1413_s1 + $0x1d8] sm:$0xff]  }
  0x10   :  { %963 = vmatprep.subr.bf16.mxu0 %v1091_v16  ;;  %706 = vmatprep.mubr.bf16.mxu0 %v207_v46  ;;  %v217_v51 = vcombine.high %v207_v46, %v207_v46  ;;  %v214_v53 = vrot.slane %v186_v48, %v1258_v34  ;;  %v1115_v58 = vld [vmem:[%s1413_s1 + $0x188] sm:$0xff]   ;;  %v1119_v62 = vld [vmem:[%s1413_s1 + $0x190] sm:$0xff]   ;;  %v1121_v0 = vld [vmem:[%s1413_s1 + $0x118] sm:$0xff]  }
  0x11   :  { %984 = vmatpush3.bf16.msra.mxu1 %v1090_v15  ;;  %v1124_v1 = vld [vmem:[%s1413_s1 + $0x160] sm:$0xff]   ;;  %v1123_v2 = vld [vmem:[%s1413_s1 + $0x198] sm:$0xff]   ;;  %v1128_v5 = vld [vmem:[%s1413_s1 + $0x168] sm:$0xff]  }
  0x12   :  { %985 = vmatprep.subr.bf16.mxu1 %v1093_v18  ;;  %746 = vmatprep.mubr.bf16.mxu1 %v217_v51  ;;  %v218_v56 = vcombine.high %v214_v53, %v214_v53  ;;  %v1126_v3 = vld [vmem:[%s1413_s1 + $0x1e0] sm:$0xff]   ;;  %v1130_v7 = vld [vmem:[%s1413_s1 + $0x1e8] sm:$0xff]   ;;  %v1132_v9 = vld [vmem:[%s1413_s1 + $0x170] sm:$0xff]  }
  0x13   :  { %964 = vmatpush3.bf16.msra.mxu0 %v1092_v17  ;;  %v1125_v4 = vld [vmem:[%s1413_s1 + $0x120] sm:$0xff]   ;;  %v1129_v8 = vld [vmem:[%s1413_s1 + $0x128] sm:$0xff]   ;;  %v1134_v11 = vld [vmem:[%s1413_s1 + $0x1f0] sm:$0xff]   ;;  %v200_v17 = vrot.slane %v1278_v44, %v1258_v34 }
  0x14   :  { %965 = vmatprep.subr.bf16.mxu0 %v1095_v20  ;;  %v1127_v6 = vld [vmem:[%s1413_s1 + $0x1a0] sm:$0xff]   ;;  %v1131_v10 = vld [vmem:[%s1413_s1 + $0x1a8] sm:$0xff]   ;;  %v1133_v12 = vld [vmem:[%s1413_s1 + $0x130] sm:$0xff]   ;;  %v1149_v20 = vmov 0.0  }
  0x15   :  { %986 = vmatpush3.bf16.msra.mxu1 %v1094_v19  ;;  %v1136_v13 = vld [vmem:[%s1413_s1 + $0x178] sm:$0xff]   ;;  %v1135_v14 = vld [vmem:[%s1413_s1 + $0x1b0] sm:$0xff]   ;;  %v1140_v19 = vld [vmem:[%s1413_s1 + $0x200] sm:$0xff]   ;;  %v216_v21 = vcombine.high %v200_v17, %v200_v17 }
  0x16   :  { %987 = vmatprep.subr.bf16.mxu1 %v1097_v25  ;;  %v1138_v15 = vld [vmem:[%s1413_s1 + $0x1f8] sm:$0xff]   ;;  %v1141_v22 = vld [vmem:[%s1413_s1 + $0x208] sm:$0xff]   ;;  %v1142_v25 = vld [vmem:[%s1413_s1 + $0x210] sm:$0xff]  }
  0x17   :  { %966 = vmatpush3.bf16.msra.mxu0 %v1096_v24  ;;  %v1137_v16 = vld [vmem:[%s1413_s1 + $0x138] sm:$0xff]   ;;  %v882_v23 = vld.sshfl [vmem:[%s1414_s0 + $0x8] sm:$0x1 pattern:$0x75316420]  ;;  %v1146_v29 = vld [vmem:[%s1413_s1 + $0x230] sm:$0xff]  }
  0x18   :  { %967 = vmatprep.subr.bf16.mxu0 %v1099_v27  ;;  %v1139_v18 = vld [vmem:[%s1413_s1 + $0x1b8] sm:$0xff]   ;;  %v232_v24 = vrot.slane %v882_v23, %v1258_v34  ;;  %v1144_v27 = vld [vmem:[%s1413_s1 + $0x220] sm:$0xff]   ;;  %v1145_v28 = vld [vmem:[%s1413_s1 + $0x228] sm:$0xff]  }
  0x19   :  { %988 = vmatpush3.bf16.msra.mxu1 %v1098_v26  ;;  %v1143_v26 = vld [vmem:[%s1413_s1 + $0x218] sm:$0xff]  }
  0x1a   :  { %989 = vmatprep.subr.bf16.mxu1 %v1101_v31 }
  0x1b   :  { %968 = vmatpush3.bf16.msra.mxu0 %v1100_v30  ;;  %v1147_v30 = vld [vmem:[%s1413_s1 + $0x238] sm:$0xff]  }
  0x1c   :  { %969 = vmatprep.subr.bf16.mxu0 %v1103_v33 }
  0x1d   :  { %990 = vmatpush3.bf16.msra.mxu1 %v1102_v32  ;;  %v881_v32 = vld [vmem:[%s1415_s2] ss:$0 sm:$0xff] }
  0x1e   :  { %991 = vmatprep.subr.bf16.mxu1 %v1105_v36 }
  0x1f   :  { %970 = vmatpush3.bf16.msra.mxu0 %v1104_v35 }
  0x20   :  { %999 = vmatprep.subr.bf16.mxu0 %v1108_v41 }
  0x21   :  { %992 = vmatpush3.bf16.msra.mxu1 %v1107_v40 }
  0x22   :  { %1021 = vmatprep.subr.bf16.mxu1 %v1110_v45  ;;  %707 = vmatmul.mubr.bf16.vlgmr.msra.gmra.mrb[0].mxu0 %v193_v43 }
  0x23   :  { %1000 = vmatpush3.bf16.msra.mxu0 %v1109_v47  ;;  %786 = vmatprep.mubr.bf16.mxu0 %v214_v53 }
  0x24   :  { %747 = vmatmul.mubr.bf16.vlgmr.msra.gmra.mrb[0].mxu1 %v215_v49  ;;  %1001 = vmatprep.subr.bf16.mxu0 %v1112_v50 }
  0x25   :  { %1022 = vmatpush3.bf16.msra.mxu1 %v1111_v52  ;;  %826 = vmatprep.mubr.bf16.mxu1 %v218_v56 }
  0x26   :  { %1023 = vmatprep.subr.bf16.mxu1 %v1114_v54 }
  0x27   :  { %1002 = vmatpush3.bf16.msra.mxu0 %v1113_v55 }
  0x28   :  { %1003 = vmatprep.subr.bf16.mxu0 %v1116_v57 }
  0x29   :  { %1024 = vmatpush3.bf16.msra.mxu1 %v1115_v58 }
  0x2a   :  { %1025 = vmatprep.subr.bf16.mxu1 %v1118_v59 }
  0x2b   :  { %1004 = vmatpush3.bf16.msra.mxu0 %v1117_v60 }
  0x2c   :  { %1005 = vmatprep.subr.bf16.mxu0 %v1120_v61 }
  0x2d   :  { %1026 = vmatpush3.bf16.msra.mxu1 %v1119_v62 }
  0x2e   :  { %1027 = vmatprep.subr.bf16.mxu1 %v1122_v63 }
  0x2f   :  { %1006 = vmatpush3.bf16.msra.mxu0 %v1121_v0 }
  0x30   :  { %1007 = vmatprep.subr.bf16.mxu0 %v1124_v1 }
  0x31   :  { %1028 = vmatpush3.bf16.msra.mxu1 %v1123_v2 }
  0x32   :  { %1029 = vmatprep.subr.bf16.mxu1 %v1126_v3 }
  0x33   :  { %1008 = vmatpush3.bf16.msra.mxu0 %v1125_v4 }
  0x34   :  { %1009 = vmatprep.subr.bf16.mxu0 %v1128_v5 }
  0x35   :  { %1030 = vmatpush3.bf16.msra.mxu1 %v1127_v6 }
  0x36   :  { %1031 = vmatprep.subr.bf16.mxu1 %v1130_v7 }
  0x37   :  { %1010 = vmatpush3.bf16.msra.mxu0 %v1129_v8 }
  0x38   :  { %1011 = vmatprep.subr.bf16.mxu0 %v1132_v9 }
  0x39   :  { %1032 = vmatpush3.bf16.msra.mxu1 %v1131_v10 }
  0x3a   :  { %1033 = vmatprep.subr.bf16.mxu1 %v1134_v11 }
  0x3b   :  { %1012 = vmatpush3.bf16.msra.mxu0 %v1133_v12 }
  0x3c   :  { %1013 = vmatprep.subr.bf16.mxu0 %v1136_v13 }
  0x3d   :  { %1034 = vmatpush3.bf16.msra.mxu1 %v1135_v14 }
  0x3e   :  { %1035 = vmatprep.subr.bf16.mxu1 %v1138_v15 }
  0x3f   :  { %1014 = vmatpush3.bf16.msra.mxu0 %v1137_v16 }
  0x40   :  { %1052 = vmatprep.subr.bf16.mxu0 %v1149_v20 }
  0x41   :  { %1036 = vmatpush3.bf16.msra.mxu1 %v1139_v18 }
  0x42   :  { %787 = vmatmul.mubr.bf16.vlgmr.msra.gmra.mrb[4].mxu0 %v200_v17 }
  0x43   :  { %1053 = vmatpush3.bf16.msra.mxu0 %v1140_v19  ;;  %1068 = vmatprep.mubr.msk.bf16.mxu0 %vm1150_vm0, %v1149_v20 }
  0x44   :  { %827 = vmatmul.mubr.bf16.vlgmr.msra.gmra.mrb[4].mxu1 %v216_v21  ;;  %1054 = vmatprep.subr.bf16.mxu0 %v1149_v20 }
  0x47   :  { %1055 = vmatpush3.bf16.msra.mxu0 %v1141_v22 }
  0x48   :  { %1056 = vmatprep.subr.bf16.mxu0 %v1149_v20 }
  0x4b   :  { %1057 = vmatpush3.bf16.msra.mxu0 %v1142_v25 }
  0x4c   :  { %1058 = vmatprep.subr.bf16.mxu0 %v1149_v20 }
  0x4f   :  { %1059 = vmatpush3.bf16.msra.mxu0 %v1143_v26 }
  0x50   :  { %1060 = vmatprep.subr.bf16.mxu0 %v1149_v20 }
  0x53   :  { %1061 = vmatpush3.bf16.msra.mxu0 %v1144_v27 }
  0x54   :  { %1062 = vmatprep.subr.bf16.mxu0 %v1149_v20 }
  0x57   :  { %1063 = vmatpush3.bf16.msra.mxu0 %v1145_v28 }
  0x58   :  { %1064 = vmatprep.subr.bf16.mxu0 %v1149_v20 }
  0x5b   :  { %1065 = vmatpush3.bf16.msra.mxu0 %v1146_v29 }
  0x5c   :  { %1066 = vmatprep.subr.bf16.mxu0 %v1149_v20 }
  0x5f   :  { %1067 = vmatpush3.bf16.msra.mxu0 %v1147_v30 }
  0x62   :  { %1069 = vmatmul.mubr.bf16.vlgmr.msra.gmra.mrb[8].mxu0 %v232_v24 }
  0xf5   :  { %v971_v31 = vpop.f32.mrb[0].mxu0 }
  0xf6   :  { %v972_v33 = vpop.f32.mrb[1].mxu0 }
  0xf7   :  { %v973_v34 = vadd.f32 %v972_v33, %v971_v31  ;;  %v974_v35 = vpop.f32.mrb[2].mxu0  ;;  %v993_v36 = vpop.f32.mrb[0].mxu1 }
  0xf8   :  { %v975_v37 = vpop.f32.mrb[3].mxu0  ;;  %v994_v38 = vpop.f32.mrb[1].mxu1 }
  0xf9   :  { %v709_v39 = vadd.f32 %v973_v34, %v881_v32  ;;  %v995_v40 = vadd.f32 %v994_v38, %v993_v36  ;;  %v996_v41 = vpop.f32.mrb[2].mxu1 }
  0xfa   :  { %v997_v42 = vpop.f32.mrb[3].mxu1 }
  0xfb   :  { %v749_v43 = vadd.f32 %v995_v40, %v709_v39 }
 0x115   :  { %v1015_v44 = vpop.f32.mrb[4].mxu0 }
 0x116   :  { %v1016_v45 = vpop.f32.mrb[5].mxu0 }
 0x117   :  { %v1017_v46 = vadd.f32 %v1016_v45, %v1015_v44  ;;  %v1018_v47 = vpop.f32.mrb[6].mxu0  ;;  %v1037_v48 = vpop.f32.mrb[4].mxu1 }
 0x118   :  { %v1019_v49 = vpop.f32.mrb[7].mxu0  ;;  %v1038_v50 = vpop.f32.mrb[5].mxu1 }
 0x119   :  { %v789_v51 = vadd.f32 %v1017_v46, %v749_v43  ;;  %v1039_v52 = vadd.f32 %v1038_v50, %v1037_v48  ;;  %v1040_v53 = vpop.f32.mrb[6].mxu1 }
 0x11a   :  { %v1041_v54 = vpop.f32.mrb[7].mxu1 }
 0x11b   :  { %v829_v55 = vadd.f32 %v1039_v52, %v789_v51 }
 0x135   :  { %v868_v56 = vpop.f32.mrb[8].mxu0 }
 0x136   :  { %v869_v57 = vadd.f32 %v868_v56, %v829_v55  ;;  %v1070_v58 = vpop.f32.mrb[9].mxu0 }
 0x137   :  { %v871_v59 = vpop.f32.mrb[10].mxu0 }
 0x138   :  { %v874_v60 = vmax.f32 %v869_v57, 0.0  ;;  %v1071_v61 = vpop.f32.mrb[11].mxu0 }
 0x13a   :  { %v875_v62 = vpack.c.bf16 %v874_v60, %v874_v60 }
 0x13c   :  { %876 = vst [vmem:[%s1416_s3] sm:$0x1] %v875_v62 }

// kernel: forward.5
= control target key start
LH: loop header
LB: loop body
LE: loop exit
PB: predicated region body
PF: predicated region fallthrough
CT: control target
= control target key end

     0   :  { %s2638_s1 = inlined_call_operand.vmem [shape: bf16[2048,128], index: 1, kind: input, shape index: {}]   ;;  %s2639_s0 = inlined_call_operand.vmem [shape: bf16[18,2048], index: 0, kind: input, shape index: {}]   ;;  %s2640_s2 = inlined_call_operand.vmem [shape: f32[1,128], index: 2, kind: input, shape index: {}]   ;;  %s2641_s3 = inlined_call_operand.vmem [shape: bf16[18,128], index: 3, kind: output, shape index: {}]  }
   0x1   :  { %v2009_v0 = vld [vmem:[%s2638_s1 + $0x40] sm:$0xff]   ;;  %v2013_v4 = vld [vmem:[%s2638_s1 + $0x48] sm:$0xff]   ;;  %v2017_v8 = vld [vmem:[%s2638_s1 + $0x50] sm:$0xff]  }
   0x2   :  { %v2010_v1 = vld [vmem:[%s2638_s1 + $0xc0] sm:$0xff]   ;;  %1785 = vmatprep.subr.bf16.mxu0 %v2009_v0  ;;  %v2014_v5 = vld [vmem:[%s2638_s1 + $0xc8] sm:$0xff]   ;;  %v2018_v9 = vld [vmem:[%s2638_s1 + $0xd0] sm:$0xff]  }
   0x3   :  { %v2011_v2 = vld [vmem:[%s2638_s1] sm:$0xff]   ;;  %1813 = vmatprep.subr.bf16.mxu1 %v2010_v1  ;;  %v2015_v6 = vld [vmem:[%s2638_s1 + $0x8] sm:$0xff]   ;;  %v2019_v10 = vld [vmem:[%s2638_s1 + $0x10] sm:$0xff]  }
   0x4   :  { %v2012_v3 = vld [vmem:[%s2638_s1 + $0x80] sm:$0xff]   ;;  %1786 = vmatpush3.bf16.msra.mxu0 %v2011_v2  ;;  %v2016_v7 = vld [vmem:[%s2638_s1 + $0x88] sm:$0xff]   ;;  %v2020_v11 = vld [vmem:[%s2638_s1 + $0x90] sm:$0xff]  }
   0x5   :  { %1814 = vmatpush3.bf16.msra.mxu1 %v2012_v3  ;;  %1787 = vmatprep.subr.bf16.mxu0 %v2013_v4  ;;  %v2021_v12 = vld [vmem:[%s2638_s1 + $0x58] sm:$0xff]   ;;  %v2025_v16 = vld [vmem:[%s2638_s1 + $0x60] sm:$0xff]   ;;  %v2029_v20 = vld [vmem:[%s2638_s1 + $0x68] sm:$0xff]  }
   0x6   :  { %1815 = vmatprep.subr.bf16.mxu1 %v2014_v5  ;;  %v2022_v13 = vld [vmem:[%s2638_s1 + $0xd8] sm:$0xff]   ;;  %v2026_v17 = vld [vmem:[%s2638_s1 + $0xe0] sm:$0xff]   ;;  %v2030_v21 = vld [vmem:[%s2638_s1 + $0xe8] sm:$0xff]  }
   0x7   :  { %v2023_v14 = vld [vmem:[%s2638_s1 + $0x18] sm:$0xff]   ;;  %v2027_v18 = vld [vmem:[%s2638_s1 + $0x20] sm:$0xff]   ;;  %v2031_v22 = vld [vmem:[%s2638_s1 + $0x28] sm:$0xff]  }
   0x8   :  { %1788 = vmatpush3.bf16.msra.mxu0 %v2015_v6  ;;  %v2024_v15 = vld [vmem:[%s2638_s1 + $0x98] sm:$0xff]   ;;  %v2028_v19 = vld [vmem:[%s2638_s1 + $0xa0] sm:$0xff]   ;;  %v2032_v23 = vld [vmem:[%s2638_s1 + $0xa8] sm:$0xff]  }
   0x9   :  { %1816 = vmatpush3.bf16.msra.mxu1 %v2016_v7  ;;  %1789 = vmatprep.subr.bf16.mxu0 %v2017_v8  ;;  %v2033_v24 = vld [vmem:[%s2638_s1 + $0x70] sm:$0xff]   ;;  %v2037_v28 = vld [vmem:[%s2638_s1 + $0x78] sm:$0xff]   ;;  %v15_v32 = vld [vmem:[%s2639_s0] sm:$0xff] }
   0xa   :  { %1817 = vmatprep.subr.bf16.mxu1 %v2018_v9  ;;  %v2034_v25 = vld [vmem:[%s2638_s1 + $0xf0] sm:$0xff]   ;;  %v2038_v29 = vld [vmem:[%s2638_s1 + $0xf8] sm:$0xff]   ;;  %v23_v33 = vld [vmem:[%s2639_s0 + $0x40] sm:$0xff] }
   0xb   :  { %v2035_v26 = vld [vmem:[%s2638_s1 + $0x30] sm:$0xff]   ;;  %v2039_v30 = vld [vmem:[%s2638_s1 + $0x38] sm:$0xff]   ;;  %v16_v34 = vld [vmem:[%s2639_s0 + $0x8] sm:$0xff]  ;;  %v1614_v35 = vcombine.low %v15_v32, %v23_v33  ;;  %v1615_v36 = vcombine.high %v15_v32, %v23_v33 }
   0xc   :  { %1790 = vmatpush3.bf16.msra.mxu0 %v2019_v10  ;;  %v2036_v27 = vld [vmem:[%s2638_s1 + $0xb0] sm:$0xff]   ;;  %v2040_v31 = vld [vmem:[%s2638_s1 + $0xb8] sm:$0xff]   ;;  %v24_v37 = vld [vmem:[%s2639_s0 + $0x48] sm:$0xff] }
   0xd   :  { %1818 = vmatpush3.bf16.msra.mxu1 %v2020_v11  ;;  %1791 = vmatprep.subr.bf16.mxu0 %v2021_v12  ;;  %v1616_v38 = vcombine.low %v16_v34, %v24_v37  ;;  %v1617_v39 = vcombine.high %v16_v34, %v24_v37  ;;  %v2041_v40 = vld [vmem:[%s2638_s1 + $0x140] sm:$0xff]   ;;  %v2045_v44 = vld [vmem:[%s2638_s1 + $0x148] sm:$0xff]   ;;  %v2049_v48 = vld [vmem:[%s2638_s1 + $0x150] sm:$0xff]  }
   0xe   :  { %1819 = vmatprep.subr.bf16.mxu1 %v2022_v13  ;;  %1238 = vmatprep.mubr.bf16.mxu0 %v1615_v36  ;;  %v2042_v41 = vld [vmem:[%s2638_s1 + $0x1c0] sm:$0xff]   ;;  %v2046_v45 = vld [vmem:[%s2638_s1 + $0x1c8] sm:$0xff]   ;;  %v2050_v49 = vld [vmem:[%s2638_s1 + $0x1d0] sm:$0xff]  }
   0xf   :  { %1286 = vmatprep.mubr.bf16.mxu1 %v1617_v39  ;;  %v2043_v42 = vld [vmem:[%s2638_s1 + $0x100] sm:$0xff]   ;;  %v2047_v46 = vld [vmem:[%s2638_s1 + $0x108] sm:$0xff]   ;;  %v2051_v50 = vld [vmem:[%s2638_s1 + $0x110] sm:$0xff]  }
  0x10   :  { %1792 = vmatpush3.bf16.msra.mxu0 %v2023_v14  ;;  %v2044_v43 = vld [vmem:[%s2638_s1 + $0x180] sm:$0xff]   ;;  %v2048_v47 = vld [vmem:[%s2638_s1 + $0x188] sm:$0xff]   ;;  %v2052_v51 = vld [vmem:[%s2638_s1 + $0x190] sm:$0xff]  }
  0x11   :  { %1820 = vmatpush3.bf16.msra.mxu1 %v2024_v15  ;;  %1793 = vmatprep.subr.bf16.mxu0 %v2025_v16  ;;  %v2053_v52 = vld [vmem:[%s2638_s1 + $0x158] sm:$0xff]   ;;  %v2057_v56 = vld [vmem:[%s2638_s1 + $0x160] sm:$0xff]   ;;  %v2061_v60 = vld [vmem:[%s2638_s1 + $0x168] sm:$0xff]  }
  0x12   :  { %1821 = vmatprep.subr.bf16.mxu1 %v2026_v17  ;;  %v2054_v53 = vld [vmem:[%s2638_s1 + $0x1d8] sm:$0xff]   ;;  %v2058_v57 = vld [vmem:[%s2638_s1 + $0x1e0] sm:$0xff]   ;;  %v2062_v61 = vld [vmem:[%s2638_s1 + $0x1e8] sm:$0xff]  }
  0x13   :  { %v2055_v54 = vld [vmem:[%s2638_s1 + $0x118] sm:$0xff]   ;;  %v2059_v58 = vld [vmem:[%s2638_s1 + $0x120] sm:$0xff]   ;;  %v2064_v0 = vld [vmem:[%s2638_s1 + $0x128] sm:$0xff]  }
  0x14   :  { %1794 = vmatpush3.bf16.msra.mxu0 %v2027_v18  ;;  %v2056_v55 = vld [vmem:[%s2638_s1 + $0x198] sm:$0xff]   ;;  %v2060_v59 = vld [vmem:[%s2638_s1 + $0x1a0] sm:$0xff]   ;;  %v2065_v2 = vld [vmem:[%s2638_s1 + $0x1a8] sm:$0xff]  }
  0x15   :  { %1822 = vmatpush3.bf16.msra.mxu1 %v2028_v19  ;;  %1795 = vmatprep.subr.bf16.mxu0 %v2029_v20  ;;  %v31_v62 = vld [vmem:[%s2639_s0 + $0x80] sm:$0x11]  ;;  %v32_v3 = vld [vmem:[%s2639_s0 + $0x88] sm:$0x11]  ;;  %v2069_v6 = vld [vmem:[%s2638_s1 + $0x170] sm:$0xff]  }
  0x16   :  { %1823 = vmatprep.subr.bf16.mxu1 %v2030_v21  ;;  %v1631_v63 = vcombine.high %v31_v62, %v31_v62  ;;  %v1630_v1 = vcombine.low %v31_v62, %v31_v62  ;;  %v1633_v4 = vcombine.high %v32_v3, %v32_v3  ;;  %v1632_v5 = vcombine.low %v32_v3, %v32_v3  ;;  %v2070_v7 = vld [vmem:[%s2638_s1 + $0x1f0] sm:$0xff]   ;;  %v2073_v10 = vld [vmem:[%s2638_s1 + $0x178] sm:$0xff]   ;;  %v20_v62 = vld [vmem:[%s2639_s0 + $0x28] sm:$0xff] }
  0x17   :  { %v2071_v8 = vld [vmem:[%s2638_s1 + $0x130] sm:$0xff]   ;;  %v2074_v11 = vld [vmem:[%s2638_s1 + $0x1f8] sm:$0xff]  }
  0x18   :  { %1796 = vmatpush3.bf16.msra.mxu0 %v2031_v22  ;;  %v2072_v9 = vld [vmem:[%s2638_s1 + $0x1b0] sm:$0xff]   ;;  %v2075_v12 = vld [vmem:[%s2638_s1 + $0x138] sm:$0xff]   ;;  %v2077_v22 = vld [vmem:[%s2638_s1 + $0x240] sm:$0xff]  }
  0x19   :  { %1824 = vmatpush3.bf16.msra.mxu1 %v2032_v23  ;;  %1797 = vmatprep.subr.bf16.mxu0 %v2033_v24  ;;  %v2076_v13 = vld [vmem:[%s2638_s1 + $0x1b8] sm:$0xff]   ;;  %v17_v14 = vld [vmem:[%s2639_s0 + $0x10] sm:$0xff]  ;;  %v2078_v23 = vld [vmem:[%s2638_s1 + $0x2c0] sm:$0xff]  }
  0x1a   :  { %1825 = vmatprep.subr.bf16.mxu1 %v2034_v25  ;;  %v25_v15 = vld [vmem:[%s2639_s0 + $0x50] sm:$0xff]  ;;  %v18_v16 = vld [vmem:[%s2639_s0 + $0x18] sm:$0xff]  ;;  %v2079_v24 = vld [vmem:[%s2638_s1 + $0x200] sm:$0xff]  }
  0x1b   :  { %v1618_v17 = vcombine.low %v17_v14, %v25_v15  ;;  %v1619_v18 = vcombine.high %v17_v14, %v25_v15  ;;  %v26_v19 = vld [vmem:[%s2639_s0 + $0x58] sm:$0xff]  ;;  %v2080_v25 = vld [vmem:[%s2638_s1 + $0x280] sm:$0xff]   ;;  %v2087_v33 = vld [vmem:[%s2638_s1 + $0x250] sm:$0xff]  }
  0x1c   :  { %1798 = vmatpush3.bf16.msra.mxu0 %v2035_v26  ;;  %v1620_v20 = vcombine.low %v18_v16, %v26_v19  ;;  %v1621_v21 = vcombine.high %v18_v16, %v26_v19  ;;  %v2081_v26 = vld [vmem:[%s2638_s1 + $0x248] sm:$0xff]   ;;  %v2088_v34 = vld [vmem:[%s2638_s1 + $0x2d0] sm:$0xff]  }
  0x1d   :  { %1826 = vmatpush3.bf16.msra.mxu1 %v2036_v27  ;;  %1799 = vmatprep.subr.bf16.mxu0 %v2037_v28  ;;  %v2082_v27 = vld [vmem:[%s2638_s1 + $0x2c8] sm:$0xff]   ;;  %v2090_v37 = vld [vmem:[%s2638_s1 + $0x210] sm:$0xff]  }
  0x1e   :  { %1827 = vmatprep.subr.bf16.mxu1 %v2038_v29  ;;  %v2083_v28 = vld [vmem:[%s2638_s1 + $0x208] sm:$0xff]   ;;  %v2091_v39 = vld [vmem:[%s2638_s1 + $0x290] sm:$0xff]  }
  0x1f   :  { %v2084_v29 = vld [vmem:[%s2638_s1 + $0x288] sm:$0xff]   ;;  %v2123_v15 = vld [vmem:[%s2638_s1 + $0x350] sm:$0xff]  }
  0x20   :  { %1800 = vmatpush3.bf16.msra.mxu0 %v2039_v30  ;;  %v33_v30 = vld [vmem:[%s2639_s0 + $0x90] sm:$0x11] }
  0x21   :  { %1828 = vmatpush3.bf16.msra.mxu1 %v2040_v31  ;;  %1841 = vmatprep.subr.bf16.mxu0 %v2041_v40  ;;  %v1635_v31 = vcombine.high %v33_v30, %v33_v30  ;;  %v1634_v32 = vcombine.low %v33_v30, %v33_v30  ;;  %v2093_v40 = vld [vmem:[%s2638_s1 + $0x258] sm:$0xff]   ;;  %v2124_v16 = vld [vmem:[%s2638_s1 + $0x3d0] sm:$0xff]   ;;  %v2137_v30 = vld [vmem:[%s2638_s1 + $0x368] sm:$0xff]  }
  0x22   :  { %1869 = vmatprep.subr.bf16.mxu1 %v2042_v41  ;;  %v2094_v41 = vld [vmem:[%s2638_s1 + $0x2d8] sm:$0xff]   ;;  %v2126_v19 = vld [vmem:[%s2638_s1 + $0x310] sm:$0xff]  }
  0x23   :  { %1239 = vmatmul.mubr.bf16.vlgmr.msra.gmra.mrb[0].mxu0 %v1614_v35  ;;  %v34_v35 = vld [vmem:[%s2639_s0 + $0x98] sm:$0x11] }
  0x24   :  { %1287 = vmatmul.mubr.bf16.vlgmr.msra.gmra.mrb[0].mxu1 %v1616_v38  ;;  %1842 = vmatpush3.bf16.msra.mxu0 %v2043_v42  ;;  %v1637_v36 = vcombine.high %v34_v35, %v34_v35  ;;  %v1636_v38 = vcombine.low %v34_v35, %v34_v35  ;;  %v2095_v42 = vld [vmem:[%s2638_s1 + $0x218] sm:$0xff]   ;;  %v2142_v35 = vld [vmem:[%s2638_s1 + $0x3f0] sm:$0xff]  }
  0x25   :  { %1870 = vmatpush3.bf16.msra.mxu1 %v2044_v43  ;;  %1843 = vmatprep.subr.bf16.mxu0 %v2045_v44  ;;  %v2096_v43 = vld [vmem:[%s2638_s1 + $0x298] sm:$0xff]   ;;  %v2097_v44 = vld [vmem:[%s2638_s1 + $0x260] sm:$0xff]  }
  0x26   :  { %1871 = vmatprep.subr.bf16.mxu1 %v2046_v45  ;;  %1246 = vmatprep.mubr.bf16.mxu0 %v1631_v63  ;;  %v2098_v45 = vld [vmem:[%s2638_s1 + $0x2e0] sm:$0xff]  }
  0x27   :  { %1294 = vmatprep.mubr.bf16.mxu1 %v1633_v4  ;;  %v2113_v4 = vld [vmem:[%s2638_s1 + $0x340] sm:$0xff]  }
  0x28   :  { %1844 = vmatpush3.bf16.msra.mxu0 %v2047_v46  ;;  %v2099_v46 = vld [vmem:[%s2638_s1 + $0x220] sm:$0xff]  }
  0x29   :  { %1872 = vmatpush3.bf16.msra.mxu1 %v2048_v47  ;;  %1845 = vmatprep.subr.bf16.mxu0 %v2049_v48  ;;  %v2100_v47 = vld [vmem:[%s2638_s1 + $0x2a0] sm:$0xff]   ;;  %v2101_v48 = vld [vmem:[%s2638_s1 + $0x268] sm:$0xff]  }
  0x2a   :  { %1873 = vmatprep.subr.bf16.mxu1 %v2050_v49  ;;  %v2102_v49 = vld [vmem:[%s2638_s1 + $0x2e8] sm:$0xff]  }
  0x2b   :  { %1247 = vmatmul.mubr.bf16.gmra.mrb[4].mxu0 %v1630_v1  ;;  %v28_v1 = vld [vmem:[%s2639_s0 + $0x68] sm:$0xff] }
  0x2c   :  { %1846 = vmatpush3.bf16.msra.mxu0 %v2051_v50  ;;  %1295 = vmatmul.mubr.bf16.gmra.mrb[4].mxu1 %v1632_v5  ;;  %v2103_v50 = vld [vmem:[%s2638_s1 + $0x228] sm:$0xff]   ;;  %v1625_v3 = vcombine.high %v20_v62, %v28_v1  ;;  %v2114_v5 = vld [vmem:[%s2638_s1 + $0x3c0] sm:$0xff]  }
  0x2d   :  { %1874 = vmatpush3.bf16.msra.mxu1 %v2052_v51  ;;  %1847 = vmatprep.subr.bf16.mxu0 %v2053_v52  ;;  %v2104_v51 = vld [vmem:[%s2638_s1 + $0x2a8] sm:$0xff]   ;;  %v2105_v52 = vld [vmem:[%s2638_s1 + $0x270] sm:$0xff]  }
  0x2e   :  { %1875 = vmatprep.subr.bf16.mxu1 %v2054_v53  ;;  %1334 = vmatprep.mubr.bf16.mxu0 %v1619_v18  ;;  %v2106_v53 = vld [vmem:[%s2638_s1 + $0x2f0] sm:$0xff]  }
  0x2f   :  { %1382 = vmatprep.mubr.bf16.mxu1 %v1621_v21  ;;  %v2127_v21 = vld [vmem:[%s2638_s1 + $0x390] sm:$0xff]  }
  0x30   :  { %1848 = vmatpush3.bf16.msra.mxu0 %v2055_v54  ;;  %v2107_v54 = vld [vmem:[%s2638_s1 + $0x230] sm:$0xff]  }
  0x31   :  { %1876 = vmatpush3.bf16.msra.mxu1 %v2056_v55  ;;  %1849 = vmatprep.subr.bf16.mxu0 %v2057_v56  ;;  %v2108_v55 = vld [vmem:[%s2638_s1 + $0x2b0] sm:$0xff]   ;;  %v2109_v56 = vld [vmem:[%s2638_s1 + $0x278] sm:$0xff]  }
  0x32   :  { %1877 = vmatprep.subr.bf16.mxu1 %v2058_v57  ;;  %v2110_v57 = vld [vmem:[%s2638_s1 + $0x2f8] sm:$0xff]  }
  0x34   :  { %1850 = vmatpush3.bf16.msra.mxu0 %v2059_v58  ;;  %v2111_v58 = vld [vmem:[%s2638_s1 + $0x238] sm:$0xff]  }
  0x35   :  { %1878 = vmatpush3.bf16.msra.mxu1 %v2060_v59  ;;  %1851 = vmatprep.subr.bf16.mxu0 %v2061_v60  ;;  %v2112_v59 = vld [vmem:[%s2638_s1 + $0x2b8] sm:$0xff]   ;;  %v19_v60 = vld [vmem:[%s2639_s0 + $0x20] sm:$0xff] }
  0x36   :  { %1879 = vmatprep.subr.bf16.mxu1 %v2062_v61  ;;  %v27_v61 = vld [vmem:[%s2639_s0 + $0x60] sm:$0xff] }
  0x37   :  { %v1622_v63 = vcombine.low %v19_v60, %v27_v61 }
  0x38   :  { %1852 = vmatpush3.bf16.msra.mxu0 %v2064_v0  ;;  %v1623_v0 = vcombine.high %v19_v60, %v27_v61 }
  0x39   :  { %1880 = vmatpush3.bf16.msra.mxu1 %v2065_v2  ;;  %1853 = vmatprep.subr.bf16.mxu0 %v2069_v6  ;;  %v1624_v2 = vcombine.low %v20_v62, %v28_v1  ;;  %v2115_v6 = vld [vmem:[%s2638_s1 + $0x300] sm:$0xff]  }
  0x3a   :  { %1881 = vmatprep.subr.bf16.mxu1 %v2070_v7  ;;  %v2116_v7 = vld [vmem:[%s2638_s1 + $0x380] sm:$0xff]  }
  0x3c   :  { %1854 = vmatpush3.bf16.msra.mxu0 %v2071_v8  ;;  %v2117_v8 = vld [vmem:[%s2638_s1 + $0x348] sm:$0xff]  }
  0x3d   :  { %1882 = vmatpush3.bf16.msra.mxu1 %v2072_v9  ;;  %1855 = vmatprep.subr.bf16.mxu0 %v2073_v10  ;;  %v2118_v9 = vld [vmem:[%s2638_s1 + $0x3c8] sm:$0xff]  }
  0x3e   :  { %1883 = vmatprep.subr.bf16.mxu1 %v2074_v11  ;;  %v2119_v10 = vld [vmem:[%s2638_s1 + $0x308] sm:$0xff]  }
  0x3f   :  { %v2120_v11 = vld [vmem:[%s2638_s1 + $0x388] sm:$0xff]  }
  0x40   :  { %1856 = vmatpush3.bf16.msra.mxu0 %v2075_v12  ;;  %v35_v12 = vld [vmem:[%s2639_s0 + $0xa0] sm:$0x11] }
  0x41   :  { %1884 = vmatpush3.bf16.msra.mxu1 %v2076_v13  ;;  %1897 = vmatprep.subr.bf16.mxu0 %v2077_v22  ;;  %v1639_v13 = vcombine.high %v35_v12, %v35_v12  ;;  %v1638_v14 = vcombine.low %v35_v12, %v35_v12  ;;  %v2129_v22 = vld [vmem:[%s2638_s1 + $0x358] sm:$0xff]  }
  0x42   :  { %1925 = vmatprep.subr.bf16.mxu1 %v2078_v23  ;;  %v2130_v23 = vld [vmem:[%s2638_s1 + $0x3d8] sm:$0xff]  }
  0x43   :  { %1335 = vmatmul.mubr.bf16.vlgmr.msra.gmra.mrb[8].mxu0 %v1618_v17  ;;  %v36_v17 = vld [vmem:[%s2639_s0 + $0xa8] sm:$0x11] }
  0x44   :  { %1383 = vmatmul.mubr.bf16.vlgmr.msra.gmra.mrb[8].mxu1 %v1620_v20  ;;  %1898 = vmatpush3.bf16.msra.mxu0 %v2079_v24  ;;  %v1641_v18 = vcombine.high %v36_v17, %v36_v17  ;;  %v1640_v20 = vcombine.low %v36_v17, %v36_v17  ;;  %v2131_v24 = vld [vmem:[%s2638_s1 + $0x318] sm:$0xff]  }
  0x45   :  { %1926 = vmatpush3.bf16.msra.mxu1 %v2080_v25  ;;  %1899 = vmatprep.subr.bf16.mxu0 %v2081_v26  ;;  %v2132_v25 = vld [vmem:[%s2638_s1 + $0x398] sm:$0xff]   ;;  %v2133_v26 = vld [vmem:[%s2638_s1 + $0x360] sm:$0xff]  }
  0x46   :  { %1927 = vmatprep.subr.bf16.mxu1 %v2082_v27  ;;  %1342 = vmatprep.mubr.bf16.mxu0 %v1635_v31  ;;  %v2134_v27 = vld [vmem:[%s2638_s1 + $0x3e0] sm:$0xff]   ;;  %v2138_v31 = vld [vmem:[%s2638_s1 + $0x3e8] sm:$0xff]  }
  0x47   :  { %1390 = vmatprep.mubr.bf16.mxu1 %v1637_v36  ;;  %v2143_v36 = vld [vmem:[%s2638_s1 + $0x330] sm:$0xff]  }
  0x48   :  { %1900 = vmatpush3.bf16.msra.mxu0 %v2083_v28  ;;  %v2135_v28 = vld [vmem:[%s2638_s1 + $0x320] sm:$0xff]  }
  0x49   :  { %1928 = vmatpush3.bf16.msra.mxu1 %v2084_v29  ;;  %1901 = vmatprep.subr.bf16.mxu0 %v2087_v33  ;;  %v2136_v29 = vld [vmem:[%s2638_s1 + $0x3a0] sm:$0xff]   ;;  %v2140_v33 = vld [vmem:[%s2638_s1 + $0x3a8] sm:$0xff]  }
  0x4a   :  { %1929 = vmatprep.subr.bf16.mxu1 %v2088_v34  ;;  %v2141_v34 = vld [vmem:[%s2638_s1 + $0x370] sm:$0xff]  }
  0x4b   :  { %1343 = vmatmul.mubr.bf16.gmra.mrb[12].mxu0 %v1634_v32  ;;  %v2139_v32 = vld [vmem:[%s2638_s1 + $0x328] sm:$0xff]  }
  0x4c   :  { %1902 = vmatpush3.bf16.msra.mxu0 %v2090_v37  ;;  %1391 = vmatmul.mubr.bf16.gmra.mrb[12].mxu1 %v1636_v38  ;;  %v2144_v37 = vld [vmem:[%s2638_s1 + $0x3b0] sm:$0xff]   ;;  %v2145_v38 = vld [vmem:[%s2638_s1 + $0x378] sm:$0xff]  }
  0x4d   :  { %1930 = vmatpush3.bf16.msra.mxu1 %v2091_v39  ;;  %1903 = vmatprep.subr.bf16.mxu0 %v2093_v40  ;;  %v2146_v39 = vld [vmem:[%s2638_s1 + $0x3f8] sm:$0xff]  }
  0x4e   :  { %1931 = vmatprep.subr.bf16.mxu1 %v2094_v41  ;;  %1430 = vmatprep.mubr.bf16.mxu0 %v1623_v0  ;;  %v2147_v40 = vld [vmem:[%s2638_s1 + $0x338] sm:$0xff]  }
  0x4f   :  { %1478 = vmatprep.mubr.bf16.mxu1 %v1625_v3  ;;  %v2148_v41 = vld [vmem:[%s2638_s1 + $0x3b8] sm:$0xff]  }
  0x50   :  { %1904 = vmatpush3.bf16.msra.mxu0 %v2095_v42  ;;  %v21_v42 = vld [vmem:[%s2639_s0 + $0x30] sm:$0xff] }
  0x51   :  { %1932 = vmatpush3.bf16.msra.mxu1 %v2096_v43  ;;  %1905 = vmatprep.subr.bf16.mxu0 %v2097_v44  ;;  %v29_v43 = vld [vmem:[%s2639_s0 + $0x70] sm:$0xff]  ;;  %v22_v44 = vld [vmem:[%s2639_s0 + $0x38] sm:$0xff] }
  0x52   :  { %1933 = vmatprep.subr.bf16.mxu1 %v2098_v45  ;;  %v1626_v45 = vcombine.low %v21_v42, %v29_v43 }
  0x54   :  { %1906 = vmatpush3.bf16.msra.mxu0 %v2099_v46  ;;  %v1627_v46 = vcombine.high %v21_v42, %v29_v43 }
  0x55   :  { %1934 = vmatpush3.bf16.msra.mxu1 %v2100_v47  ;;  %1907 = vmatprep.subr.bf16.mxu0 %v2101_v48  ;;  %v30_v47 = vld [vmem:[%s2639_s0 + $0x78] sm:$0xff]  ;;  %v37_v48 = vld [vmem:[%s2639_s0 + $0xb0] sm:$0x11] }
  0x56   :  { %1935 = vmatprep.subr.bf16.mxu1 %v2102_v49  ;;  %v38_v49 = vld [vmem:[%s2639_s0 + $0xb8] sm:$0x11] }
  0x58   :  { %1908 = vmatpush3.bf16.msra.mxu0 %v2103_v50  ;;  %v1628_v50 = vcombine.low %v22_v44, %v30_v47 }
  0x59   :  { %1936 = vmatpush3.bf16.msra.mxu1 %v2104_v51  ;;  %1909 = vmatprep.subr.bf16.mxu0 %v2105_v52  ;;  %v1629_v51 = vcombine.high %v22_v44, %v30_v47  ;;  %v1643_v52 = vcombine.high %v37_v48, %v37_v48 }
  0x5a   :  { %1937 = vmatprep.subr.bf16.mxu1 %v2106_v53  ;;  %v1645_v53 = vcombine.high %v38_v49, %v38_v49 }
  0x5c   :  { %1910 = vmatpush3.bf16.msra.mxu0 %v2107_v54  ;;  %v1642_v54 = vcombine.low %v37_v48, %v37_v48 }
  0x5d   :  { %1938 = vmatpush3.bf16.msra.mxu1 %v2108_v55  ;;  %1911 = vmatprep.subr.bf16.mxu0 %v2109_v56  ;;  %v1644_v55 = vcombine.low %v38_v49, %v38_v49 }
  0x5e   :  { %1939 = vmatprep.subr.bf16.mxu1 %v2110_v57 }
  0x60   :  { %1912 = vmatpush3.bf16.msra.mxu0 %v2111_v58  ;;  %v1613_v58 = vld [vmem:[%s2640_s2] ss:$0 sm:$0xff] }
  0x61   :  { %1940 = vmatpush3.bf16.msra.mxu1 %v2112_v59  ;;  %1953 = vmatprep.subr.bf16.mxu0 %v2113_v4 }
  0x62   :  { %1981 = vmatprep.subr.bf16.mxu1 %v2114_v5 }
  0x63   :  { %1431 = vmatmul.mubr.bf16.vlgmr.msra.gmra.mrb[16].mxu0 %v1622_v63 }
  0x64   :  { %1479 = vmatmul.mubr.bf16.vlgmr.msra.gmra.mrb[16].mxu1 %v1624_v2  ;;  %1954 = vmatpush3.bf16.msra.mxu0 %v2115_v6 }
  0x65   :  { %1982 = vmatpush3.bf16.msra.mxu1 %v2116_v7  ;;  %1955 = vmatprep.subr.bf16.mxu0 %v2117_v8 }
  0x66   :  { %1983 = vmatprep.subr.bf16.mxu1 %v2118_v9  ;;  %1438 = vmatprep.mubr.bf16.mxu0 %v1639_v13 }
  0x67   :  { %1486 = vmatprep.mubr.bf16.mxu1 %v1641_v18 }
  0x68   :  { %1956 = vmatpush3.bf16.msra.mxu0 %v2119_v10 }
  0x69   :  { %1984 = vmatpush3.bf16.msra.mxu1 %v2120_v11  ;;  %1957 = vmatprep.subr.bf16.mxu0 %v2123_v15 }
  0x6a   :  { %1985 = vmatprep.subr.bf16.mxu1 %v2124_v16 }
  0x6b   :  { %1439 = vmatmul.mubr.bf16.gmra.mrb[20].mxu0 %v1638_v14 }
  0x6c   :  { %1958 = vmatpush3.bf16.msra.mxu0 %v2126_v19  ;;  %1487 = vmatmul.mubr.bf16.gmra.mrb[20].mxu1 %v1640_v20 }
  0x6d   :  { %1986 = vmatpush3.bf16.msra.mxu1 %v2127_v21  ;;  %1959 = vmatprep.subr.bf16.mxu0 %v2129_v22 }
  0x6e   :  { %1987 = vmatprep.subr.bf16.mxu1 %v2130_v23  ;;  %1526 = vmatprep.mubr.bf16.mxu0 %v1627_v46 }
  0x6f   :  { %1574 = vmatprep.mubr.bf16.mxu1 %v1629_v51 }
  0x70   :  { %1960 = vmatpush3.bf16.msra.mxu0 %v2131_v24 }
  0x71   :  { %1988 = vmatpush3.bf16.msra.mxu1 %v2132_v25  ;;  %1961 = vmatprep.subr.bf16.mxu0 %v2133_v26 }
  0x72   :  { %1989 = vmatprep.subr.bf16.mxu1 %v2134_v27 }
  0x74   :  { %1962 = vmatpush3.bf16.msra.mxu0 %v2135_v28 }
  0x75   :  { %1990 = vmatpush3.bf16.msra.mxu1 %v2136_v29  ;;  %1963 = vmatprep.subr.bf16.mxu0 %v2137_v30 }
  0x76   :  { %1991 = vmatprep.subr.bf16.mxu1 %v2138_v31 }
  0x78   :  { %1964 = vmatpush3.bf16.msra.mxu0 %v2139_v32 }
  0x79   :  { %1992 = vmatpush3.bf16.msra.mxu1 %v2140_v33  ;;  %1965 = vmatprep.subr.bf16.mxu0 %v2141_v34 }
  0x7a   :  { %1993 = vmatprep.subr.bf16.mxu1 %v2142_v35 }
  0x7c   :  { %1966 = vmatpush3.bf16.msra.mxu0 %v2143_v36 }
  0x7d   :  { %1994 = vmatpush3.bf16.msra.mxu1 %v2144_v37  ;;  %1967 = vmatprep.subr.bf16.mxu0 %v2145_v38 }
  0x7e   :  { %1995 = vmatprep.subr.bf16.mxu1 %v2146_v39 }
  0x80   :  { %1968 = vmatpush3.bf16.msra.mxu0 %v2147_v40 }
  0x81   :  { %1996 = vmatpush3.bf16.msra.mxu1 %v2148_v41 }
  0x83   :  { %1527 = vmatmul.mubr.bf16.vlgmr.msra.gmra.mrb[24].mxu0 %v1626_v45 }
  0x84   :  { %1575 = vmatmul.mubr.bf16.vlgmr.msra.gmra.mrb[24].mxu1 %v1628_v50  ;;  %1534 = vmatprep.mubr.bf16.mxu0 %v1643_v52 }
  0x85   :  { %1582 = vmatprep.mubr.bf16.mxu1 %v1645_v53 }
  0x8b   :  { %1535 = vmatmul.mubr.bf16.gmra.mrb[28].mxu0 %v1642_v54 }
  0x8c   :  { %1583 = vmatmul.mubr.bf16.gmra.mrb[28].mxu1 %v1644_v55 }
  0xf6   :  { %v1801_v56 = vpop.f32.mrb[0].mxu0 }
  0xf7   :  { %v1829_v57 = vpop.f32.mrb[0].mxu1  ;;  %v1802_v59 = vpop.f32.mrb[1].mxu0 }
  0xf8   :  { %v1803_v60 = vadd.f32 %v1802_v59, %v1801_v56  ;;  %v1830_v61 = vpop.f32.mrb[1].mxu1  ;;  %v1804_v62 = vpop.f32.mrb[2].mxu0 }
  0xf9   :  { %v1831_v63 = vadd.f32 %v1830_v61, %v1829_v57  ;;  %v1832_v0 = vpop.f32.mrb[2].mxu1  ;;  %v1805_v1 = vpop.f32.mrb[3].mxu0 }
  0xfa   :  { %v1241_v2 = vadd.f32 %v1803_v60, %v1613_v58  ;;  %v1806_v3 = vadd.f32 %v1805_v1, %v1804_v62  ;;  %v1833_v4 = vpop.f32.mrb[3].mxu1 }
  0xfb   :  { %v1834_v5 = vadd.f32 %v1833_v4, %v1832_v0 }
  0xfc   :  { %v1289_v6 = vadd.f32 %v1831_v63, %v1241_v2  ;;  %v1244_v7 = vadd.f32 %v1806_v3, %v1613_v58 }
  0xfe   :  { %v1292_v8 = vadd.f32 %v1834_v5, %v1244_v7  ;;  %v1807_v9 = vpop.f32.mrb[4].mxu0 }
  0xff   :  { %v1808_v10 = vpop.f32.mrb[5].mxu0  ;;  %v1835_v13 = vpop.f32.mrb[4].mxu1 }
 0x100   :  { %v1809_v11 = vadd.f32 %v1808_v10, %v1807_v9  ;;  %v1810_v12 = vpop.f32.mrb[6].mxu0  ;;  %v1836_v15 = vpop.f32.mrb[5].mxu1 }
 0x101   :  { %v1811_v14 = vpop.f32.mrb[7].mxu0  ;;  %v1837_v17 = vadd.f32 %v1836_v15, %v1835_v13  ;;  %v1838_v18 = vpop.f32.mrb[6].mxu1 }
 0x102   :  { %v1249_v16 = vadd.f32 %v1809_v11, %v1613_v58  ;;  %v1839_v19 = vpop.f32.mrb[7].mxu1 }
 0x104   :  { %v1297_v20 = vadd.f32 %v1837_v17, %v1249_v16 }
 0x116   :  { %v1857_v21 = vpop.f32.mrb[8].mxu0 }
 0x117   :  { %v1885_v22 = vpop.f32.mrb[8].mxu1  ;;  %v1858_v23 = vpop.f32.mrb[9].mxu0 }
 0x118   :  { %v1859_v24 = vadd.f32 %v1858_v23, %v1857_v21  ;;  %v1886_v25 = vpop.f32.mrb[9].mxu1  ;;  %v1860_v26 = vpop.f32.mrb[10].mxu0 }
 0x119   :  { %v1887_v27 = vadd.f32 %v1886_v25, %v1885_v22  ;;  %v1888_v28 = vpop.f32.mrb[10].mxu1  ;;  %v1861_v29 = vpop.f32.mrb[11].mxu0 }
 0x11a   :  { %v1337_v30 = vadd.f32 %v1859_v24, %v1289_v6  ;;  %v1862_v31 = vadd.f32 %v1861_v29, %v1860_v26  ;;  %v1889_v32 = vpop.f32.mrb[11].mxu1 }
 0x11b   :  { %v1890_v33 = vadd.f32 %v1889_v32, %v1888_v28 }
 0x11c   :  { %v1385_v34 = vadd.f32 %v1887_v27, %v1337_v30  ;;  %v1340_v35 = vadd.f32 %v1862_v31, %v1292_v8 }
 0x11e   :  { %v1388_v36 = vadd.f32 %v1890_v33, %v1340_v35  ;;  %v1863_v37 = vpop.f32.mrb[12].mxu0 }
 0x11f   :  { %v1864_v38 = vpop.f32.mrb[13].mxu0  ;;  %v1891_v41 = vpop.f32.mrb[12].mxu1 }
 0x120   :  { %v1865_v39 = vadd.f32 %v1864_v38, %v1863_v37  ;;  %v1866_v40 = vpop.f32.mrb[14].mxu0  ;;  %v1892_v44 = vpop.f32.mrb[13].mxu1 }
 0x121   :  { %v1867_v42 = vpop.f32.mrb[15].mxu0  ;;  %v1893_v45 = vadd.f32 %v1892_v44, %v1891_v41  ;;  %v1894_v46 = vpop.f32.mrb[14].mxu1 }
 0x122   :  { %v1345_v43 = vadd.f32 %v1865_v39, %v1297_v20  ;;  %v1895_v47 = vpop.f32.mrb[15].mxu1 }
 0x124   :  { %v1393_v48 = vadd.f32 %v1893_v45, %v1345_v43 }
 0x136   :  { %v1913_v49 = vpop.f32.mrb[16].mxu0 }
 0x137   :  { %v1941_v50 = vpop.f32.mrb[16].mxu1  ;;  %v1914_v51 = vpop.f32.mrb[17].mxu0 }
 0x138   :  { %v1915_v52 = vadd.f32 %v1914_v51, %v1913_v49  ;;  %v1942_v53 = vpop.f32.mrb[17].mxu1  ;;  %v1916_v54 = vpop.f32.mrb[18].mxu0 }
 0x139   :  { %v1943_v55 = vadd.f32 %v1942_v53, %v1941_v50  ;;  %v1944_v56 = vpop.f32.mrb[18].mxu1  ;;  %v1917_v57 = vpop.f32.mrb[19].mxu0 }
 0x13a   :  { %v1433_v58 = vadd.f32 %v1915_v52, %v1385_v34  ;;  %v1918_v59 = vadd.f32 %v1917_v57, %v1916_v54  ;;  %v1945_v60 = vpop.f32.mrb[19].mxu1 }
 0x13b   :  { %v1946_v61 = vadd.f32 %v1945_v60, %v1944_v56 }
 0x13c   :  { %v1481_v62 = vadd.f32 %v1943_v55, %v1433_v58  ;;  %v1436_v63 = vadd.f32 %v1918_v59, %v1388_v36 }
 0x13e   :  { %v1484_v0 = vadd.f32 %v1946_v61, %v1436_v63  ;;  %v1919_v1 = vpop.f32.mrb[20].mxu0 }
 0x13f   :  { %v1920_v2 = vpop.f32.mrb[21].mxu0  ;;  %v1947_v5 = vpop.f32.mrb[20].mxu1 }
 0x140   :  { %v1921_v3 = vadd.f32 %v1920_v2, %v1919_v1  ;;  %v1922_v4 = vpop.f32.mrb[22].mxu0  ;;  %v1948_v8 = vpop.f32.mrb[21].mxu1 }
 0x141   :  { %v1923_v6 = vpop.f32.mrb[23].mxu0  ;;  %v1949_v9 = vadd.f32 %v1948_v8, %v1947_v5  ;;  %v1950_v10 = vpop.f32.mrb[22].mxu1 }
 0x142   :  { %v1441_v7 = vadd.f32 %v1921_v3, %v1393_v48  ;;  %v1951_v11 = vpop.f32.mrb[23].mxu1 }
 0x144   :  { %v1489_v12 = vadd.f32 %v1949_v9, %v1441_v7 }
 0x156   :  { %v1969_v13 = vpop.f32.mrb[24].mxu0 }
 0x157   :  { %v1997_v14 = vpop.f32.mrb[24].mxu1  ;;  %v1970_v15 = vpop.f32.mrb[25].mxu0 }
 0x158   :  { %v1971_v16 = vadd.f32 %v1970_v15, %v1969_v13  ;;  %v1998_v17 = vpop.f32.mrb[25].mxu1  ;;  %v1972_v18 = vpop.f32.mrb[26].mxu0 }
 0x159   :  { %v1999_v19 = vadd.f32 %v1998_v17, %v1997_v14  ;;  %v2000_v20 = vpop.f32.mrb[26].mxu1  ;;  %v1973_v21 = vpop.f32.mrb[27].mxu0 }
 0x15a   :  { %v1529_v22 = vadd.f32 %v1971_v16, %v1481_v62  ;;  %v1974_v23 = vadd.f32 %v1973_v21, %v1972_v18  ;;  %v2001_v24 = vpop.f32.mrb[27].mxu1 }
 0x15b   :  { %v2002_v25 = vadd.f32 %v2001_v24, %v2000_v20 }
 0x15c   :  { %v1577_v26 = vadd.f32 %v1999_v19, %v1529_v22  ;;  %v1532_v27 = vadd.f32 %v1974_v23, %v1484_v0 }
 0x15e   :  { %v1580_v28 = vadd.f32 %v2002_v25, %v1532_v27  ;;  %v1975_v29 = vpop.f32.mrb[28].mxu0  ;;  %v1590_v32 = vmax.f32 %v1577_v26, 0.0 }
 0x15f   :  { %v2003_v30 = vpop.f32.mrb[28].mxu1  ;;  %v1976_v31 = vpop.f32.mrb[29].mxu0 }
 0x160   :  { %v1591_v33 = vmax.f32 %v1580_v28, 0.0  ;;  %v1977_v34 = vadd.f32 %v1976_v31, %v1975_v29  ;;  %v2004_v35 = vpop.f32.mrb[29].mxu1  ;;  %v1978_v36 = vpop.f32.mrb[30].mxu0 }
 0x161   :  { %v2005_v37 = vadd.f32 %v2004_v35, %v2003_v30  ;;  %v2006_v38 = vpop.f32.mrb[30].mxu1  ;;  %v1979_v39 = vpop.f32.mrb[31].mxu0 }
 0x162   :  { %v1783_v40 = vpack.c.bf16 %v1591_v33, %v1590_v32  ;;  %v1537_v41 = vadd.f32 %v1977_v34, %v1489_v12  ;;  %v2007_v42 = vpop.f32.mrb[31].mxu1 }
 0x164   :  { %v1585_v43 = vadd.f32 %v2005_v37, %v1537_v41  ;;  %1784 = vst [vmem:[%s2641_s3] sm:$0xff] %v1783_v40  }
 0x166   :  { %v1592_v44 = vmax.f32 %v1585_v43, 0.0 }
 0x168   :  { %v1779_v45 = vpack.c.bf16 %v1592_v44, %v1592_v44 }
 0x16a   :  { %1608 = vst [vmem:[%s2641_s3 + $0x8] sm:$0x1] %v1779_v45 }

// kernel: forward.7
= control target key start
LH: loop header
LB: loop body
LE: loop exit
PB: predicated region body
PF: predicated region fallthrough
CT: control target
= control target key end

     0   :  { %v900_v2 = vmov 0   ;;  %s1145_s0 = inlined_call_operand.vmem [shape: bf16[2,128], index: 0, kind: input, shape index: {}]   ;;  %s1146_s1 = inlined_call_operand.vmem [shape: bf16[128,512], index: 1, kind: input, shape index: {}]   ;;  %s1147_s2 = inlined_call_operand.vmem [shape: f32[1,512], index: 2, kind: input, shape index: {}]   ;;  %s1148_s3 = inlined_call_operand.vmem [shape: bf16[512,128], index: 3, kind: input, shape index: {}]   ;;  %s1149_s4 = inlined_call_operand.vmem [shape: f32[1,128], index: 4, kind: input, shape index: {}]   ;;  %s1150_s5 = inlined_call_operand.hbm [shape: f32[2,128], index: 5, kind: output, shape index: {}]  }
   0x1   :  { %v796_v0 = vld [vmem:[%s1146_s1 + $0x4] ss:$16 sps:$4 sm:$0xff]   ;;  %v798_v1 = vld [vmem:[%s1146_s1 + $0xc] ss:$16 sps:$4 sm:$0xff]   ;;  %269 = vmatprep.mubr.bf16.mxu0 %v900_v2  ;;  %310 = vmatprep.mubr.bf16.mxu1 %v900_v2  ;;  %v800_v3 = vld [vmem:[%s1146_s1] ss:$16 sps:$4 sm:$0xff]  }
   0x2   :  { %237 = vmatprep.subr.bf16.mxu0 %v796_v0  ;;  %v801_v4 = vld [vmem:[%s1146_s1 + $0x8] ss:$16 sps:$4 sm:$0xff]   ;;  %278 = vmatprep.subr.bf16.mxu1 %v798_v1  ;;  %v802_v5 = vld [vmem:[%s1146_s1 + $0x24] ss:$16 sps:$4 sm:$0xff]   ;;  %v804_v6 = vld [vmem:[%s1146_s1 + $0x2c] ss:$16 sps:$4 sm:$0xff]  }
   0x3   :  { %238 = vmatpush1.bf16.msra.mxu0 %v800_v3  ;;  %279 = vmatpush1.bf16.msra.mxu1 %v801_v4  ;;  %v806_v7 = vld [vmem:[%s1146_s1 + $0x20] ss:$16 sps:$4 sm:$0xff]   ;;  %v807_v8 = vld [vmem:[%s1146_s1 + $0x28] ss:$16 sps:$4 sm:$0xff]   ;;  %v808_v9 = vld [vmem:[%s1146_s1 + $0x44] ss:$16 sps:$4 sm:$0xff]  }
   0x4   :  { %239 = vmatprep.subr.bf16.mxu0 %v802_v5  ;;  %280 = vmatprep.subr.bf16.mxu1 %v804_v6  ;;  %v810_v10 = vld [vmem:[%s1146_s1 + $0x4c] ss:$16 sps:$4 sm:$0xff]   ;;  %v812_v11 = vld [vmem:[%s1146_s1 + $0x40] ss:$16 sps:$4 sm:$0xff]   ;;  %v813_v12 = vld [vmem:[%s1146_s1 + $0x48] ss:$16 sps:$4 sm:$0xff]  }
   0x5   :  { %v814_v13 = vld [vmem:[%s1146_s1 + $0x64] ss:$16 sps:$4 sm:$0xff]   ;;  %v816_v14 = vld [vmem:[%s1146_s1 + $0x6c] ss:$16 sps:$4 sm:$0xff]   ;;  %v818_v15 = vld [vmem:[%s1146_s1 + $0x60] ss:$16 sps:$4 sm:$0xff]  }
   0x6   :  { %v819_v16 = vld [vmem:[%s1146_s1 + $0x68] ss:$16 sps:$4 sm:$0xff]   ;;  %v820_v17 = vld [vmem:[%s1146_s1 + $0x84] ss:$16 sps:$4 sm:$0xff]   ;;  %v822_v18 = vld [vmem:[%s1146_s1 + $0x8c] ss:$16 sps:$4 sm:$0xff]  }
   0x7   :  { %240 = vmatpush1.bf16.msra.mxu0 %v806_v7  ;;  %281 = vmatpush1.bf16.msra.mxu1 %v807_v8  ;;  %v824_v19 = vld [vmem:[%s1146_s1 + $0x80] ss:$16 sps:$4 sm:$0xff]   ;;  %v825_v20 = vld [vmem:[%s1146_s1 + $0x88] ss:$16 sps:$4 sm:$0xff]   ;;  %v826_v21 = vld [vmem:[%s1146_s1 + $0xa4] ss:$16 sps:$4 sm:$0xff]  }
   0x8   :  { %241 = vmatprep.subr.bf16.mxu0 %v808_v9  ;;  %282 = vmatprep.subr.bf16.mxu1 %v810_v10  ;;  %v828_v22 = vld [vmem:[%s1146_s1 + $0xac] ss:$16 sps:$4 sm:$0xff]   ;;  %v830_v23 = vld [vmem:[%s1146_s1 + $0xa0] ss:$16 sps:$4 sm:$0xff]   ;;  %v831_v24 = vld [vmem:[%s1146_s1 + $0xa8] ss:$16 sps:$4 sm:$0xff]  }
   0x9   :  { %v832_v25 = vld [vmem:[%s1146_s1 + $0xc4] ss:$16 sps:$4 sm:$0xff]   ;;  %v834_v26 = vld [vmem:[%s1146_s1 + $0xcc] ss:$16 sps:$4 sm:$0xff]   ;;  %v836_v27 = vld [vmem:[%s1146_s1 + $0xc0] ss:$16 sps:$4 sm:$0xff]  }
   0xa   :  { %v837_v28 = vld [vmem:[%s1146_s1 + $0xc8] ss:$16 sps:$4 sm:$0xff]   ;;  %v838_v29 = vld [vmem:[%s1146_s1 + $0xe4] ss:$16 sps:$4 sm:$0xff]   ;;  %v840_v30 = vld [vmem:[%s1146_s1 + $0xec] ss:$16 sps:$4 sm:$0xff]  }
   0xb   :  { %242 = vmatpush1.bf16.msra.mxu0 %v812_v11  ;;  %283 = vmatpush1.bf16.msra.mxu1 %v813_v12  ;;  %v842_v31 = vld [vmem:[%s1146_s1 + $0xe0] ss:$16 sps:$4 sm:$0xff]   ;;  %v843_v32 = vld [vmem:[%s1146_s1 + $0xe8] ss:$16 sps:$4 sm:$0xff]  }
   0xc   :  { %243 = vmatprep.subr.bf16.mxu0 %v814_v13  ;;  %284 = vmatprep.subr.bf16.mxu1 %v816_v14  ;;  %v844_v33 = vld [vmem:[%s1148_s3 + $0x40] sm:$0xff]   ;;  %v848_v38 = vld [vmem:[%s1148_s3 + $0x48] sm:$0xff]   ;;  %v852_v42 = vld [vmem:[%s1148_s3 + $0x50] sm:$0xff]  }
   0xd   :  { %v845_v34 = vld [vmem:[%s1148_s3 + $0xc0] sm:$0xff]   ;;  %v849_v39 = vld [vmem:[%s1148_s3 + $0xc8] sm:$0xff]   ;;  %v853_v43 = vld [vmem:[%s1148_s3 + $0xd0] sm:$0xff]  }
   0xe   :  { %v22_v35 = vld [vmem:[%s1145_s0] sm:$0x1]  ;;  %v850_v40 = vld [vmem:[%s1148_s3 + $0x8] sm:$0xff]   ;;  %v854_v44 = vld [vmem:[%s1148_s3 + $0x10] sm:$0xff]  }
   0xf   :  { %244 = vmatpush1.bf16.msra.mxu0 %v818_v15  ;;  %285 = vmatpush1.bf16.msra.mxu1 %v819_v16  ;;  %v846_v36 = vld [vmem:[%s1148_s3] sm:$0xff]   ;;  %v851_v41 = vld [vmem:[%s1148_s3 + $0x88] sm:$0xff]   ;;  %v855_v45 = vld [vmem:[%s1148_s3 + $0x90] sm:$0xff]  }
  0x10   :  { %245 = vmatprep.subr.bf16.mxu0 %v820_v17  ;;  %286 = vmatprep.subr.bf16.mxu1 %v822_v18  ;;  %v847_v37 = vld [vmem:[%s1148_s3 + $0x80] sm:$0xff]   ;;  %v856_v46 = vld [vmem:[%s1148_s3 + $0x58] sm:$0xff]   ;;  %v864_v54 = vld [vmem:[%s1148_s3 + $0x68] sm:$0xff]  }
  0x11   :  { %v857_v47 = vld [vmem:[%s1148_s3 + $0xd8] sm:$0xff]   ;;  %v860_v50 = vld [vmem:[%s1148_s3 + $0x60] sm:$0xff]   ;;  %v865_v55 = vld [vmem:[%s1148_s3 + $0xe8] sm:$0xff]  }
  0x12   :  { %v858_v48 = vld [vmem:[%s1148_s3 + $0x18] sm:$0xff]   ;;  %v861_v51 = vld [vmem:[%s1148_s3 + $0xe0] sm:$0xff]  }
  0x13   :  { %246 = vmatpush1.bf16.msra.mxu0 %v824_v19  ;;  %287 = vmatpush1.bf16.msra.mxu1 %v825_v20  ;;  %v859_v49 = vld [vmem:[%s1148_s3 + $0x98] sm:$0xff]   ;;  %v862_v52 = vld [vmem:[%s1148_s3 + $0x20] sm:$0xff]  }
  0x14   :  { %247 = vmatprep.subr.bf16.mxu0 %v826_v21  ;;  %288 = vmatprep.subr.bf16.mxu1 %v828_v22  ;;  %v863_v53 = vld [vmem:[%s1148_s3 + $0xa0] sm:$0xff]  }
  0x17   :  { %248 = vmatpush1.bf16.msra.mxu0 %v830_v23  ;;  %289 = vmatpush1.bf16.msra.mxu1 %v831_v24 }
  0x18   :  { %249 = vmatprep.subr.bf16.mxu0 %v832_v25  ;;  %290 = vmatprep.subr.bf16.mxu1 %v834_v26 }
  0x1b   :  { %250 = vmatpush1.bf16.msra.mxu0 %v836_v27  ;;  %291 = vmatpush1.bf16.msra.mxu1 %v837_v28 }
  0x1c   :  { %251 = vmatprep.subr.bf16.mxu0 %v838_v29  ;;  %292 = vmatprep.subr.bf16.mxu1 %v840_v30 }
  0x1f   :  { %252 = vmatpush1.bf16.msra.mxu0 %v842_v31  ;;  %293 = vmatpush1.bf16.msra.mxu1 %v843_v32 }
  0x20   :  { %750 = vmatprep.subr.bf16.mxu0 %v844_v33  ;;  %772 = vmatprep.subr.bf16.mxu1 %v845_v34 }
  0x22   :  { %270 = vmatmul.mubr.bf16.vlgmr.msra.gmra.mrb[0].mxu0 %v22_v35  ;;  %311 = vmatmul.mubr.bf16.vlgmr.msra.gmra.mrb[0].mxu1 %v22_v35 }
  0x23   :  { %751 = vmatpush3.bf16.msra.mxu0 %v846_v36  ;;  %773 = vmatpush3.bf16.msra.mxu1 %v847_v37 }
  0x24   :  { %752 = vmatprep.subr.bf16.mxu0 %v848_v38  ;;  %774 = vmatprep.subr.bf16.mxu1 %v849_v39 }
  0x27   :  { %753 = vmatpush3.bf16.msra.mxu0 %v850_v40  ;;  %775 = vmatpush3.bf16.msra.mxu1 %v851_v41 }
  0x28   :  { %754 = vmatprep.subr.bf16.mxu0 %v852_v42  ;;  %776 = vmatprep.subr.bf16.mxu1 %v853_v43 }
  0x2b   :  { %755 = vmatpush3.bf16.msra.mxu0 %v854_v44  ;;  %777 = vmatpush3.bf16.msra.mxu1 %v855_v45 }
  0x2c   :  { %756 = vmatprep.subr.bf16.mxu0 %v856_v46  ;;  %778 = vmatprep.subr.bf16.mxu1 %v857_v47 }
  0x2f   :  { %757 = vmatpush3.bf16.msra.mxu0 %v858_v48  ;;  %779 = vmatpush3.bf16.msra.mxu1 %v859_v49 }
  0x30   :  { %758 = vmatprep.subr.bf16.mxu0 %v860_v50  ;;  %780 = vmatprep.subr.bf16.mxu1 %v861_v51 }
  0x31   :  { %10 = vsyncpa [#allocation3], 0  ;;  %v866_v56 = vld [vmem:[%s1148_s3 + $0x28] sm:$0xff]   ;;  %v868_v58 = vld [vmem:[%s1148_s3 + $0x70] sm:$0xff]   ;;  %v57_v2 = vlaneseq  ;;  %s901_s0 = smov [#allocation2]  }
  0x32   :  { %v867_v57 = vld [vmem:[%s1148_s3 + $0xa8] sm:$0xff]   ;;  %v869_v59 = vld [vmem:[%s1148_s3 + $0xf0] sm:$0xff]   ;;  %v872_v62 = vld [vmem:[%s1148_s3 + $0x78] sm:$0xff]   ;;  %s677_s20 = sshll.u32 %s901_s0, 4  ;;  %s678_s20 = int_to_ptr.vmem [resolvable:$true] %s677_s20 }
  0x33   :  { %759 = vmatpush3.bf16.msra.mxu0 %v862_v52  ;;  %781 = vmatpush3.bf16.msra.mxu1 %v863_v53  ;;  %v870_v60 = vld [vmem:[%s1148_s3 + $0x30] sm:$0xff]   ;;  %v873_v63 = vld [vmem:[%s1148_s3 + $0xf8] sm:$0xff]   ;;  %v58_v3 = vshrl.u32 %v57_v2, 7  ;;  %v55_v6 = vld [vmem:[%s1147_s2] sm:$0xf]  ;;  %s876_s21 = scalar_lea.vmem %s678_s20, 32  ;;  %p881_p1 = scmp.lt.s32.totalorder %s678_s20, %s678_s20 }
  0x34   :  { %760 = vmatprep.subr.bf16.mxu0 %v864_v54  ;;  %782 = vmatprep.subr.bf16.mxu1 %v865_v55  ;;  %v871_v61 = vld [vmem:[%s1148_s3 + $0xb0] sm:$0xff]   ;;  %v874_v0 = vld [vmem:[%s1148_s3 + $0x38] sm:$0xff]   ;;  %v717_v35 = vld [vmem:[%s1149_s4] ss:$0 sm:$0xff]  ;;  %p877_p0 = scmp.ne.s32.totalorder %s678_s20, %s876_s21  ;;  %p882_p2 = scmp.lt.s32.totalorder %s876_s21, %s876_s21 }
  0x35   :  { %v875_v1 = vld [vmem:[%s1148_s3 + $0xb8] sm:$0xff]   ;;  %v59_v4 = vsub.s32 0, %v58_v3  ;;  %v67_v5 = vsub.s32 2, %v58_v3  ;;  %v63_v7 = vsub.s32 1, %v58_v3  ;;  %v71_v8 = vsub.s32 3, %v58_v3 }
  0x36   :  { %p883_p3 = por %p882_p2, %p881_p1 }
  0x37   :  { %761 = vmatpush3.bf16.msra.mxu0 %v866_v56  ;;  %783 = vmatpush3.bf16.msra.mxu1 %v867_v57  ;;  %v60_v9 = vrot.slane %v55_v6, %v59_v4  ;;  %v68_v10 = vrot.slane %v55_v6, %v67_v5  ;;  %v64_v11 = vrot.slane %v55_v6, %v63_v7 }
  0x38   :  { %762 = vmatprep.subr.bf16.mxu0 %v868_v58  ;;  %784 = vmatprep.subr.bf16.mxu1 %v869_v59  ;;  %v72_v12 = vrot.slane %v55_v6, %v71_v8  ;;  %p884_p4 = pnand %p883_p3, %p877_p0 }
  0x3b   :  { %763 = vmatpush3.bf16.msra.mxu0 %v870_v60  ;;  %785 = vmatpush3.bf16.msra.mxu1 %v871_v61 }
  0x3c   :  { %764 = vmatprep.subr.bf16.mxu0 %v872_v62  ;;  %786 = vmatprep.subr.bf16.mxu1 %v873_v63 }
  0x3f   :  { %765 = vmatpush3.bf16.msra.mxu0 %v874_v0  ;;  %787 = vmatpush3.bf16.msra.mxu1 %v875_v1 }
  0xf5   :  { %v271_v13 = vpop.f32.mrb[0].mxu0  ;;  %v312_v14 = vpop.f32.mrb[0].mxu1 }
  0xf6   :  { %v272_v15 = vadd.f32 %v271_v13, %v60_v9  ;;  %v313_v16 = vadd.f32 %v312_v14, %v68_v10  ;;  %v273_v17 = vpop.f32.mrb[1].mxu0  ;;  %v314_v18 = vpop.f32.mrb[1].mxu1 }
  0xf7   :  { %v274_v19 = vadd.f32 %v273_v17, %v64_v11  ;;  %v315_v20 = vadd.f32 %v314_v18, %v72_v12  ;;  %v275_v21 = vpop.f32.mrb[2].mxu0  ;;  %v316_v22 = vpop.f32.mrb[2].mxu1 }
  0xf8   :  { %v319_v23 = vmax.f32 %v272_v15, 0.0  ;;  %v321_v24 = vmax.f32 %v313_v16, 0.0  ;;  %v276_v25 = vpop.f32.mrb[3].mxu0  ;;  %v317_v26 = vpop.f32.mrb[3].mxu1 }
  0xf9   :  { %v320_v27 = vmax.f32 %v274_v19, 0.0  ;;  %v322_v28 = vmax.f32 %v315_v20, 0.0 }
  0xfa   :  { %v325_v29 = vpack.c.bf16 %v321_v24, %v321_v24  ;;  %v323_v32 = vpack.c.bf16 %v319_v23, %v319_v23 }
  0xfb   :  { %v324_v30 = vpack.c.bf16 %v320_v27, %v320_v27  ;;  %v326_v31 = vpack.c.bf16 %v322_v28, %v322_v28 }
  0xfd   :  { %622 = vmatprep.mubr.bf16.mxu0 %v324_v30  ;;  %662 = vmatprep.mubr.bf16.mxu1 %v326_v31 }
  0xfe   :  { %623 = vmatmul.mubr.bf16.vlgmr.msra.gmra.mrb[4].mxu0 %v323_v32  ;;  %663 = vmatmul.mubr.bf16.vlgmr.msra.gmra.mrb[4].mxu1 %v325_v29 }
 0x1d1   :  { %v766_v33 = vpop.f32.mrb[4].mxu0  ;;  %v788_v34 = vpop.f32.mrb[4].mxu1 }
 0x1d2   :  { %v767_v36 = vpop.f32.mrb[5].mxu0  ;;  %v789_v37 = vpop.f32.mrb[5].mxu1 }
 0x1d3   :  { %v768_v38 = vadd.f32 %v767_v36, %v766_v33  ;;  %v790_v39 = vadd.f32 %v789_v37, %v788_v34  ;;  %v769_v40 = vpop.f32.mrb[6].mxu0  ;;  %v791_v41 = vpop.f32.mrb[6].mxu1 }
 0x1d4   :  { %v770_v42 = vpop.f32.mrb[7].mxu0  ;;  %v792_v43 = vpop.f32.mrb[7].mxu1 }
 0x1d5   :  { %v625_v44 = vadd.f32 %v768_v38, %v717_v35 }
 0x1d7   :  { %v665_v45 = vadd.f32 %v790_v39, %v625_v44 }
 0x1d9   :  { %670 = vst [vmem:[#allocation2] sm:$0x3] %v665_v45 }
 0x1da   :  { %887 = shalt.err (!%p884_p4)
}
 0x1db   :  { %s888_s23 = scalar_lea.hbm %s1150_s5, 32 }
 0x1dc   :  { %p889_p5 = scmp.ne.s32.totalorder %s1150_s5, %s888_s23  ;;  %p892_p6 = scmp.lt.u32.totalorder %s888_s23, %s1150_s5 }
 0x1de   :  { %p894_p7 = pnand %p892_p6, %p889_p5 }
 0x1e0   :  { %897 = shalt.err (!%p894_p7)
}
 0x1e1   :  { %680 = dma.vmem_to_hbm [thread:$0]  %s678_s20, 32, %s1150_s5, [#allocation3]  }
 0x1e2   :  { %898 = dma.done.wait [#allocation3], 32  }
 0x1e3   :  { %899 = vsyncadd [#allocation3], 4294967264 }
 0x1e4   :  { %684 = vsyncpa [#allocation3], 1 }

</bundles_post_ra>
